<compile_context>
chip_gen: v7x
topology: tpu7x:2x2x1
jax: 0.10.0
libtpu: 0.0.40
codegen_flags: <defaults>
</compile_context>

<pallas_src>
import functools

import jax
import jax.numpy as jnp
from jax.experimental import pallas as pl
from jax.experimental.pallas import tpu as pltpu

F32 = jnp.float32
BF16 = jnp.bfloat16


# ---------------------------------------------------------------------------
# in-kernel helpers
# ---------------------------------------------------------------------------
def _gelu(x):
    # TODO(synk): Whisper uses exact (erf) GELU; tanh approximation kept for
    # Mosaic-safe lowering (numerical diff ~1e-3).
    c = 0.7978845608028654  # sqrt(2/pi)
    return 0.5 * x * (1.0 + jnp.tanh(c * (x + 0.044715 * x * x * x)))


def _layernorm(x, g, b, eps=1e-5):
    mu = jnp.mean(x, axis=-1, keepdims=True)
    var = jnp.mean((x - mu) * (x - mu), axis=-1, keepdims=True)
    return (x - mu) * jax.lax.rsqrt(var + eps) * g + b


def _mm(a, b):
    # bf16 MXU operands, fp32 accumulation.
    return jnp.dot(a.astype(BF16), b.astype(BF16), preferred_element_type=F32)


# ---------------------------------------------------------------------------
# Pallas kernels
# ---------------------------------------------------------------------------
def conv_gelu_kernel(*refs, has_pos):
    # taps_ref: (1, T, 3*Cin) im2col taps (k-major along channels)
    # w_ref:    (3*Cin, D) bf16,  b_ref: (1, D)
    # pos_ref:  (T, D)  (conv2 only: positional embedding fused in epilogue)
    if has_pos:
        taps_ref, w_ref, b_ref, pos_ref, o_ref = refs
    else:
        taps_ref, w_ref, b_ref, o_ref = refs
        pos_ref = None
    y = _mm(taps_ref[0], w_ref[...]) + b_ref[...]
    y = _gelu(y)
    if pos_ref is not None:
        y = y + pos_ref[...]
    o_ref[0] = y


def encoder_layer_kernel(x_ref, ln1_g, ln1_b, wqkv, bqkv, wo, bo,
                         ln2_g, ln2_b, w1, b1, w2, b2, o_ref,
                         *, n_heads, scale):
    # One full pre-LN transformer encoder layer for one batch element.
    # x_ref/o_ref: (1, T, D).  All intermediates stay in VMEM.
    # TODO(synk): for real Whisper T~1500 replace the full (T, T) scores with
    # a flash-style KV-tiled online softmax to bound VMEM on v7x.
    x = x_ref[0]                                              # (T, D) f32
    D = x.shape[-1]
    dh = D // n_heads

    # --- self attention (pre-LN), fused QKV projection ---
    h = _layernorm(x, ln1_g[...], ln1_b[...])
    qkv = _mm(h, wqkv[...]) + bqkv[...]                       # (T, 3D) f32
    q = qkv[:, :D] * scale                                    # scale q, not scores
    heads = []
    for hh in range(n_heads):  # static unroll; head split via column slices
        lo, hi = hh * dh, (hh + 1) * dh
        s = jax.lax.dot_general(q[:, lo:hi].astype(BF16),
                                qkv[:, D + lo:D + hi].astype(BF16),
                                (((1,), (1,)), ((), ())),
                                preferred_element_type=F32)   # (T, T)
        s = s - jnp.max(s, axis=-1, keepdims=True)
        p = jnp.exp(s)
        p = p * pl.reciprocal(jnp.sum(p, axis=-1, keepdims=True), approx=True)
        heads.append(_mm(p, qkv[:, 2 * D + lo:2 * D + hi]))   # (T, dh)
    attn = jnp.concatenate(heads, axis=-1)                    # (T, D) lane-dense
    x = x + _mm(attn, wo[...]) + bo[...]                      # residual 1

    # --- feed forward (pre-LN) ---
    h = _layernorm(x, ln2_g[...], ln2_b[...])
    h = _gelu(_mm(h, w1[...]) + b1[...])
    o_ref[0] = x + _mm(h, w2[...]) + b2[...]                  # residual 2


def lnf_pool_kernel(pm_ref, x_ref, g_ref, b_ref, o_ref):
    # final LayerNorm fused with the adaptive-avg-pool matmul (pool matrix).
    h = _layernorm(x_ref[0], g_ref[...], b_ref[...])
    o_ref[0] = jnp.dot(pm_ref[...], h, preferred_element_type=F32)


# ---------------------------------------------------------------------------
# pallas_call wrappers
# ---------------------------------------------------------------------------
_PAR1 = pltpu.CompilerParams(dimension_semantics=("parallel",))


def conv_gelu(taps, w, b, pos=None):
    B, T, K = taps.shape
    D = w.shape[-1]
    in_specs = [
        pl.BlockSpec((1, T, K), lambda i: (i, 0, 0)),
        pl.BlockSpec((K, D), lambda i: (0, 0)),
        pl.BlockSpec((1, D), lambda i: (0, 0)),
    ]
    args = [taps, w.astype(BF16), b]
    if pos is not None:
        in_specs.append(pl.BlockSpec((T, D), lambda i: (0, 0)))
        args.append(pos)
    return pl.pallas_call(
        functools.partial(conv_gelu_kernel, has_pos=pos is not None),
        out_shape=jax.ShapeDtypeStruct((B, T, D), F32),
        grid=(B,),
        in_specs=in_specs,
        out_specs=pl.BlockSpec((1, T, D), lambda i: (i, 0, 0)),
        compiler_params=_PAR1,
    )(*args)


def encoder_layer(x, p, n_heads):
    B, T, D = x.shape
    F = p["w1"].shape[-1]
    scale = (D // n_heads) ** -0.5

    def vec(d):
        return pl.BlockSpec((1, d), lambda i: (0, 0))

    def mat(r, c):
        return pl.BlockSpec((r, c), lambda i: (0, 0))

    return pl.pallas_call(
        functools.partial(encoder_layer_kernel, n_heads=n_heads, scale=scale),
        out_shape=jax.ShapeDtypeStruct((B, T, D), F32),
        grid=(B,),
        in_specs=[
            pl.BlockSpec((1, T, D), lambda i: (i, 0, 0)),   # x
            vec(D), vec(D),                                  # ln1 g/b
            mat(D, 3 * D), vec(3 * D),                       # fused qkv w/b
            mat(D, D), vec(D),                               # out proj w/b
            vec(D), vec(D),                                  # ln2 g/b
            mat(D, F), vec(F),                               # ffn up w/b
            mat(F, D), vec(D),                               # ffn down w/b
        ],
        out_specs=pl.BlockSpec((1, T, D), lambda i: (i, 0, 0)),
        compiler_params=_PAR1,
    )(x, p["ln1_g"], p["ln1_b"],
      p["wqkv"].astype(BF16), p["bqkv"],
      p["wo"].astype(BF16), p["bo"],
      p["ln2_g"], p["ln2_b"],
      p["w1"].astype(BF16), p["b1"],
      p["w2"].astype(BF16), p["b2"])


def lnf_pool(x, g, b, pool_mat):
    B, T, D = x.shape
    P = pool_mat.shape[0]
    return pl.pallas_call(
        lnf_pool_kernel,
        out_shape=jax.ShapeDtypeStruct((B, P, D), F32),
        grid=(B,),
        in_specs=[
            pl.BlockSpec((P, T), lambda i: (0, 0)),
            pl.BlockSpec((1, T, D), lambda i: (i, 0, 0)),
            pl.BlockSpec((1, D), lambda i: (0, 0)),
            pl.BlockSpec((1, D), lambda i: (0, 0)),
        ],
        out_specs=pl.BlockSpec((1, P, D), lambda i: (i, 0, 0)),
        compiler_params=_PAR1,
    )(pool_mat, x, g, b)


# ---------------------------------------------------------------------------
# model glue (plain JAX; all compute in the kernels above)
# ---------------------------------------------------------------------------
def _pool_matrix(pool_out, T):
    # AdaptiveAvgPool2d((pool_out, d_model)) on (B, T, d_model): identity over
    # d_model, adaptive average over time, expressed as a (pool_out, T) matmul.
    rows = []
    for i in range(pool_out):
        s = (i * T) // pool_out
        e = -(-((i + 1) * T) // pool_out)
        rows.append([1.0 / (e - s) if s <= j < e else 0.0 for j in range(T)])
    return jnp.array(rows, F32)


def whisper_forward(input_features, params, n_heads, pool_out):
    # input_features: (B, n_mels, T_in)
    x = jnp.transpose(input_features, (0, 2, 1)).astype(F32)  # (B, T, Cin)
    B, T_in, _ = x.shape

    # conv1: k=3, s=1, p=1, GELU -- single K=3*Cin matmul over im2col taps
    # TODO(synk): taps duplicate the (small) conv input 3x in HBM; could slice
    # the padded input inside the kernel with pl.ds to avoid it.
    xp = jnp.pad(x, ((0, 0), (1, 1), (0, 0)))
    taps1 = jnp.concatenate([xp[:, k:k + T_in, :] for k in range(3)], axis=-1)
    h = conv_gelu(taps1, params["conv1_w"], params["conv1_b"])

    # conv2: k=3, s=2, p=1, GELU, positional embedding fused in the epilogue
    T_enc = (T_in - 1) // 2 + 1
    hp = jnp.pad(h, ((0, 0), (1, 1), (0, 0)))
    taps2 = jnp.concatenate([hp[:, k::2, :][:, :T_enc, :] for k in range(3)],
                            axis=-1)
    h = conv_gelu(taps2, params["conv2_w"], params["conv2_b"],
                  pos=params["pos_emb"][:T_enc])

    # fully fused transformer encoder layers (one pallas_call per layer)
    for lp in params["layers"]:
        h = encoder_layer(h, lp, n_heads)

    # final LayerNorm + AdaptiveAvgPool2d fused
    pool_mat = _pool_matrix(pool_out, h.shape[1])
    return lnf_pool(h, params["lnf_g"], params["lnf_b"], pool_mat)


# ---------------------------------------------------------------------------
# deterministic synthetic parameters (whisper-tiny-like, scaled down)
# ---------------------------------------------------------------------------
def init_params(key, n_mels, d_model, n_layers, ffn_dim, max_pos):
    keys = iter(jax.random.split(key, 8 + 12 * n_layers))

    def nrm(shape, scale=0.02):
        return scale * jax.random.normal(next(keys), shape, F32)

    p = {
        "conv1_w": nrm((3 * n_mels, d_model)),   # (k*Cin, D), k-major rows
        "conv1_b": nrm((1, d_model)),
        "conv2_w": nrm((3 * d_model, d_model)),
        "conv2_b": nrm((1, d_model)),
        "pos_emb": nrm((max_pos, d_model)),
        "lnf_g": jnp.ones((1, d_model), F32),
        "lnf_b": jnp.zeros((1, d_model), F32),
        "layers": [],
    }
    for _ in range(n_layers):
        wq, wk, wv = (nrm((d_model, d_model)) for _ in range(3))
        bq, bv = nrm((1, d_model)), nrm((1, d_model))
        p["layers"].append({
            "ln1_g": jnp.ones((1, d_model), F32),
            "ln1_b": jnp.zeros((1, d_model), F32),
            # fused QKV weight/bias; Whisper k_proj has no bias
            "wqkv": jnp.concatenate([wq, wk, wv], axis=1),
            "bqkv": jnp.concatenate(
                [bq, jnp.zeros((1, d_model), F32), bv], axis=1),
            "wo": nrm((d_model, d_model)), "bo": nrm((1, d_model)),
            "ln2_g": jnp.ones((1, d_model), F32),
            "ln2_b": jnp.zeros((1, d_model), F32),
            "w1": nrm((d_model, ffn_dim)), "b1": nrm((1, ffn_dim)),
            "w2": nrm((ffn_dim, d_model)), "b2": nrm((1, d_model)),
        })
    return p


if __name__ == "__main__":
    # small analog of whisper-tiny: d_model 384->32, heads 6->4, layers 4->2,
    # n_mels 80->8, frames 3000->16 (=> encoder seq 8), pool 256->4.
    B, n_mels, T_in = 2, 8, 16
    d_model, n_heads, n_layers, ffn_dim = 32, 4, 2, 64
    T_enc = (T_in - 1) // 2 + 1   # 8, analog of max_source_positions
    pool_out = 4

    key = jax.random.PRNGKey(0)
    k_params, k_x = jax.random.split(key)
    params = init_params(k_params, n_mels, d_model, n_layers, ffn_dim, T_enc)
    input_features = jax.random.normal(k_x, (B, n_mels, T_in), F32)

    fwd = jax.jit(functools.partial(whisper_forward,
                                    n_heads=n_heads, pool_out=pool_out))
    out = jax.block_until_ready(fwd(input_features, params))
    assert out.shape == (B, pool_out, d_model), out.shape
    assert bool(jnp.all(jnp.isfinite(out)))
    print("KERNEL_OK")
</pallas_src>

<mosaic_0001>
module attributes {stable_mosaic.version = 11 : i64} {
  func.func @conv_gelu_kernel(%arg0: i32, %arg1: memref<1x16x24xf32, #tpu.memory_space<vmem>>, %arg2: memref<24x32xbf16, #tpu.memory_space<vmem>>, %arg3: memref<1x32xf32, #tpu.memory_space<vmem>>, %arg4: memref<1x16x32xf32, #tpu.memory_space<vmem>>) attributes {dimension_semantics = [#tpu.dimension_semantics<parallel>], iteration_bounds = array<i64: 2>, scalar_prefetch = 0 : i64, scratch_operands = 0 : i64, tpu.core_type = #tpu.core_type<tc>, window_params = [{transform_indices = @transform_0, window_bounds = array<i64: 1, 16, 24>}, {pipeline_mode = #tpu.pipeline_mode<synchronous>, transform_indices = @transform_1, window_bounds = array<i64: 24, 32>}, {pipeline_mode = #tpu.pipeline_mode<synchronous>, transform_indices = @transform_2, window_bounds = array<i64: 1, 32>}, {transform_indices = @transform_3, window_bounds = array<i64: 1, 16, 32>}]} {
    %c0 = arith.constant 0 : index
    %c0_0 = arith.constant 0 : index
    %c0_1 = arith.constant 0 : index
    %0 = vector.load %arg1[%c0, %c0_0, %c0_1] : memref<1x16x24xf32, #tpu.memory_space<vmem>>, vector<1x16x24xf32>
    %1 = vector.shape_cast %0 : vector<1x16x24xf32> to vector<16x24xf32>
    %c0_2 = arith.constant 0 : index
    %c0_3 = arith.constant 0 : index
    %2 = vector.load %arg2[%c0_2, %c0_3] : memref<24x32xbf16, #tpu.memory_space<vmem>>, vector<24x32xbf16>
    %3 = arith.truncf %1 : vector<16x24xf32> to vector<16x24xbf16>
    %cst = arith.constant dense<0.000000e+00> : vector<16x32xf32>
    %4 = tpu.matmul %3, %2, %cst {dimension_numbers = #tpu.dot_dimension_numbers<[1], [0], [0], [1], [0, 0, 1, 1], [], []>} : vector<16x24xbf16>, vector<24x32xbf16>, vector<16x32xf32> -> vector<16x32xf32>
    %c0_4 = arith.constant 0 : index
    %c0_5 = arith.constant 0 : index
    %5 = vector.load %arg3[%c0_4, %c0_5] : memref<1x32xf32, #tpu.memory_space<vmem>>, vector<1x32xf32>
    %6 = vector.broadcast %5 : vector<1x32xf32> to vector<16x32xf32>
    %7 = arith.addf %4, %6 : vector<16x32xf32>
    %cst_6 = arith.constant 5.000000e-01 : f32
    %8 = vector.broadcast %cst_6 : f32 to vector<16x32xf32>
    %9 = arith.mulf %8, %7 : vector<16x32xf32>
    %cst_7 = arith.constant 4.471500e-02 : f32
    %10 = vector.broadcast %cst_7 : f32 to vector<16x32xf32>
    %11 = arith.mulf %10, %7 : vector<16x32xf32>
    %12 = arith.mulf %11, %7 : vector<16x32xf32>
    %13 = arith.mulf %12, %7 : vector<16x32xf32>
    %14 = arith.addf %7, %13 : vector<16x32xf32>
    %cst_8 = arith.constant 0.797884583 : f32
    %15 = vector.broadcast %cst_8 : f32 to vector<16x32xf32>
    %16 = arith.mulf %15, %14 : vector<16x32xf32>
    %17 = math.tanh %16 : vector<16x32xf32>
    %cst_9 = arith.constant 1.000000e+00 : f32
    %18 = vector.broadcast %cst_9 : f32 to vector<16x32xf32>
    %19 = arith.addf %18, %17 : vector<16x32xf32>
    %20 = arith.mulf %9, %19 : vector<16x32xf32>
    %c0_10 = arith.constant 0 : index
    %c0_11 = arith.constant 0 : index
    %c0_12 = arith.constant 0 : index
    %21 = vector.load %arg4[%c0_10, %c0_11, %c0_12] : memref<1x16x32xf32, #tpu.memory_space<vmem>>, vector<1x16x32xf32>
    %22 = vector.shape_cast %21 : vector<1x16x32xf32> to vector<16x32xf32>
    %23 = vector.shape_cast %20 : vector<16x32xf32> to vector<1x16x32xf32>
    tpu.vector_store %arg4[%c0_10, %c0_11, %c0_12], %23 {strides = array<i32>} : memref<1x16x32xf32, #tpu.memory_space<vmem>>, vector<1x16x32xf32>,
    return
  }
  func.func @transform_0(%arg0: i32) -> (i32, i32, i32) {
    %c0_i32 = arith.constant 0 : i32
    %c0_i32_0 = arith.constant 0 : i32
    %c0_i32_1 = arith.constant 0 : i32
    return %arg0, %c0_i32, %c0_i32_0 : i32, i32, i32
  }
  func.func @transform_1(%arg0: i32) -> (i32, i32) {
    %c0_i32 = arith.constant 0 : i32
    %c0_i32_0 = arith.constant 0 : i32
    %c0_i32_1 = arith.constant 0 : i32
    return %c0_i32, %c0_i32_0 : i32, i32
  }
  func.func @transform_2(%arg0: i32) -> (i32, i32) {
    %c0_i32 = arith.constant 0 : i32
    %c0_i32_0 = arith.constant 0 : i32
    %c0_i32_1 = arith.constant 0 : i32
    return %c0_i32, %c0_i32_0 : i32, i32
  }
  func.func @transform_3(%arg0: i32) -> (i32, i32, i32) {
    %c0_i32 = arith.constant 0 : i32
    %c0_i32_0 = arith.constant 0 : i32
    %c0_i32_1 = arith.constant 0 : i32
    return %arg0, %c0_i32, %c0_i32_0 : i32, i32, i32
  }
}

module attributes {stable_mosaic.version = 11 : i64} {
  func.func @conv_gelu_kernel(%arg0: i32, %arg1: memref<1x8x96xf32, #tpu.memory_space<vmem>>, %arg2: memref<96x32xbf16, #tpu.memory_space<vmem>>, %arg3: memref<1x32xf32, #tpu.memory_space<vmem>>, %arg4: memref<8x32xf32, #tpu.memory_space<vmem>>, %arg5: memref<1x8x32xf32, #tpu.memory_space<vmem>>) attributes {dimension_semantics = [#tpu.dimension_semantics<parallel>], iteration_bounds = array<i64: 2>, scalar_prefetch = 0 : i64, scratch_operands = 0 : i64, tpu.core_type = #tpu.core_type<tc>, window_params = [{transform_indices = @transform_0, window_bounds = array<i64: 1, 8, 96>}, {pipeline_mode = #tpu.pipeline_mode<synchronous>, transform_indices = @transform_1, window_bounds = array<i64: 96, 32>}, {pipeline_mode = #tpu.pipeline_mode<synchronous>, transform_indices = @transform_2, window_bounds = array<i64: 1, 32>}, {pipeline_mode = #tpu.pipeline_mode<synchronous>, transform_indices = @transform_3, window_bounds = array<i64: 8, 32>}, {transform_indices = @transform_4, window_bounds = array<i64: 1, 8, 32>}]} {
    %c0 = arith.constant 0 : index
    %c0_0 = arith.constant 0 : index
    %c0_1 = arith.constant 0 : index
    %0 = vector.load %arg1[%c0, %c0_0, %c0_1] : memref<1x8x96xf32, #tpu.memory_space<vmem>>, vector<1x8x96xf32>
    %1 = vector.shape_cast %0 : vector<1x8x96xf32> to vector<8x96xf32>
    %c0_2 = arith.constant 0 : index
    %c0_3 = arith.constant 0 : index
    %2 = vector.load %arg2[%c0_2, %c0_3] : memref<96x32xbf16, #tpu.memory_space<vmem>>, vector<96x32xbf16>
    %3 = arith.truncf %1 : vector<8x96xf32> to vector<8x96xbf16>
    %cst = arith.constant dense<0.000000e+00> : vector<8x32xf32>
    %4 = tpu.matmul %3, %2, %cst {dimension_numbers = #tpu.dot_dimension_numbers<[1], [0], [0], [1], [0, 0, 1, 1], [], []>} : vector<8x96xbf16>, vector<96x32xbf16>, vector<8x32xf32> -> vector<8x32xf32>
    %c0_4 = arith.constant 0 : index
    %c0_5 = arith.constant 0 : index
    %5 = vector.load %arg3[%c0_4, %c0_5] : memref<1x32xf32, #tpu.memory_space<vmem>>, vector<1x32xf32>
    %6 = vector.broadcast %5 : vector<1x32xf32> to vector<8x32xf32>
    %7 = arith.addf %4, %6 : vector<8x32xf32>
    %cst_6 = arith.constant 5.000000e-01 : f32
    %8 = vector.broadcast %cst_6 : f32 to vector<8x32xf32>
    %9 = arith.mulf %8, %7 : vector<8x32xf32>
    %cst_7 = arith.constant 4.471500e-02 : f32
    %10 = vector.broadcast %cst_7 : f32 to vector<8x32xf32>
    %11 = arith.mulf %10, %7 : vector<8x32xf32>
    %12 = arith.mulf %11, %7 : vector<8x32xf32>
    %13 = arith.mulf %12, %7 : vector<8x32xf32>
    %14 = arith.addf %7, %13 : vector<8x32xf32>
    %cst_8 = arith.constant 0.797884583 : f32
    %15 = vector.broadcast %cst_8 : f32 to vector<8x32xf32>
    %16 = arith.mulf %15, %14 : vector<8x32xf32>
    %17 = math.tanh %16 : vector<8x32xf32>
    %cst_9 = arith.constant 1.000000e+00 : f32
    %18 = vector.broadcast %cst_9 : f32 to vector<8x32xf32>
    %19 = arith.addf %18, %17 : vector<8x32xf32>
    %20 = arith.mulf %9, %19 : vector<8x32xf32>
    %c0_10 = arith.constant 0 : index
    %c0_11 = arith.constant 0 : index
    %21 = vector.load %arg4[%c0_10, %c0_11] : memref<8x32xf32, #tpu.memory_space<vmem>>, vector<8x32xf32>
    %22 = arith.addf %20, %21 : vector<8x32xf32>
    %c0_12 = arith.constant 0 : index
    %c0_13 = arith.constant 0 : index
    %c0_14 = arith.constant 0 : index
    %23 = vector.load %arg5[%c0_12, %c0_13, %c0_14] : memref<1x8x32xf32, #tpu.memory_space<vmem>>, vector<1x8x32xf32>
    %24 = vector.shape_cast %23 : vector<1x8x32xf32> to vector<8x32xf32>
    %25 = vector.shape_cast %22 : vector<8x32xf32> to vector<1x8x32xf32>
    tpu.vector_store %arg5[%c0_12, %c0_13, %c0_14], %25 {strides = array<i32>} : memref<1x8x32xf32, #tpu.memory_space<vmem>>, vector<1x8x32xf32>,
    return
  }
  func.func @transform_0(%arg0: i32) -> (i32, i32, i32) {
    %c0_i32 = arith.constant 0 : i32
    %c0_i32_0 = arith.constant 0 : i32
    %c0_i32_1 = arith.constant 0 : i32
    return %arg0, %c0_i32, %c0_i32_0 : i32, i32, i32
  }
  func.func @transform_1(%arg0: i32) -> (i32, i32) {
    %c0_i32 = arith.constant 0 : i32
    %c0_i32_0 = arith.constant 0 : i32
    %c0_i32_1 = arith.constant 0 : i32
    return %c0_i32, %c0_i32_0 : i32, i32
  }
  func.func @transform_2(%arg0: i32) -> (i32, i32) {
    %c0_i32 = arith.constant 0 : i32
    %c0_i32_0 = arith.constant 0 : i32
    %c0_i32_1 = arith.constant 0 : i32
    return %c0_i32, %c0_i32_0 : i32, i32
  }
  func.func @transform_3(%arg0: i32) -> (i32, i32) {
    %c0_i32 = arith.constant 0 : i32
    %c0_i32_0 = arith.constant 0 : i32
    %c0_i32_1 = arith.constant 0 : i32
    return %c0_i32, %c0_i32_0 : i32, i32
  }
  func.func @transform_4(%arg0: i32) -> (i32, i32, i32) {
    %c0_i32 = arith.constant 0 : i32
    %c0_i32_0 = arith.constant 0 : i32
    %c0_i32_1 = arith.constant 0 : i32
    return %arg0, %c0_i32, %c0_i32_0 : i32, i32, i32
  }
}

module attributes {stable_mosaic.version = 11 : i64} {
  func.func @lnf_pool_kernel(%arg0: i32, %arg1: memref<4x8xf32, #tpu.memory_space<vmem>>, %arg2: memref<1x8x32xf32, #tpu.memory_space<vmem>>, %arg3: memref<1x32xf32, #tpu.memory_space<vmem>>, %arg4: memref<1x32xf32, #tpu.memory_space<vmem>>, %arg5: memref<1x4x32xf32, #tpu.memory_space<vmem>>) attributes {dimension_semantics = [#tpu.dimension_semantics<parallel>], iteration_bounds = array<i64: 2>, scalar_prefetch = 0 : i64, scratch_operands = 0 : i64, tpu.core_type = #tpu.core_type<tc>, window_params = [{pipeline_mode = #tpu.pipeline_mode<synchronous>, transform_indices = @transform_0, window_bounds = array<i64: 4, 8>}, {transform_indices = @transform_1, window_bounds = array<i64: 1, 8, 32>}, {pipeline_mode = #tpu.pipeline_mode<synchronous>, transform_indices = @transform_2, window_bounds = array<i64: 1, 32>}, {pipeline_mode = #tpu.pipeline_mode<synchronous>, transform_indices = @transform_3, window_bounds = array<i64: 1, 32>}, {transform_indices = @transform_4, window_bounds = array<i64: 1, 4, 32>}]} {
    %c0 = arith.constant 0 : index
    %c0_0 = arith.constant 0 : index
    %c0_1 = arith.constant 0 : index
    %0 = vector.load %arg2[%c0, %c0_0, %c0_1] : memref<1x8x32xf32, #tpu.memory_space<vmem>>, vector<1x8x32xf32>
    %1 = vector.shape_cast %0 : vector<1x8x32xf32> to vector<8x32xf32>
    %c0_2 = arith.constant 0 : index
    %c0_3 = arith.constant 0 : index
    %2 = vector.load %arg3[%c0_2, %c0_3] : memref<1x32xf32, #tpu.memory_space<vmem>>, vector<1x32xf32>
    %c0_4 = arith.constant 0 : index
    %c0_5 = arith.constant 0 : index
    %3 = vector.load %arg4[%c0_4, %c0_5] : memref<1x32xf32, #tpu.memory_space<vmem>>, vector<1x32xf32>
    %cst = arith.constant dense<0.000000e+00> : vector<8xf32>
    %4 = vector.multi_reduction <add>, %1, %cst [1] : vector<8x32xf32> to vector<8xf32>
    %5 = vector.shape_cast %4 : vector<8xf32> to vector<8x1xf32>
    %cst_6 = arith.constant 3.200000e+01 : f32
    %6 = vector.broadcast %cst_6 : f32 to vector<8x1xf32>
    %7 = arith.divf %5, %6 : vector<8x1xf32>
    %8 = vector.broadcast %7 : vector<8x1xf32> to vector<8x32xf32>
    %9 = arith.subf %1, %8 : vector<8x32xf32>
    %10 = vector.broadcast %7 : vector<8x1xf32> to vector<8x32xf32>
    %11 = arith.subf %1, %10 : vector<8x32xf32>
    %12 = arith.mulf %9, %11 : vector<8x32xf32>
    %cst_7 = arith.constant dense<0.000000e+00> : vector<8xf32>
    %13 = vector.multi_reduction <add>, %12, %cst_7 [1] : vector<8x32xf32> to vector<8xf32>
    %14 = vector.shape_cast %13 : vector<8xf32> to vector<8x1xf32>
    %cst_8 = arith.constant 3.200000e+01 : f32
    %15 = vector.broadcast %cst_8 : f32 to vector<8x1xf32>
    %16 = arith.divf %14, %15 : vector<8x1xf32>
    %17 = vector.broadcast %7 : vector<8x1xf32> to vector<8x32xf32>
    %18 = arith.subf %1, %17 : vector<8x32xf32>
    %cst_9 = arith.constant 9.99999974E-6 : f32
    %19 = vector.broadcast %cst_9 : f32 to vector<8x1xf32>
    %20 = arith.addf %16, %19 : vector<8x1xf32>
    %21 = math.rsqrt %20 : vector<8x1xf32>
    %22 = vector.broadcast %21 : vector<8x1xf32> to vector<8x32xf32>
    %23 = arith.mulf %18, %22 : vector<8x32xf32>
    %24 = vector.broadcast %2 : vector<1x32xf32> to vector<8x32xf32>
    %25 = arith.mulf %23, %24 : vector<8x32xf32>
    %26 = vector.broadcast %3 : vector<1x32xf32> to vector<8x32xf32>
    %27 = arith.addf %25, %26 : vector<8x32xf32>
    %c0_10 = arith.constant 0 : index
    %c0_11 = arith.constant 0 : index
    %28 = vector.load %arg1[%c0_10, %c0_11] : memref<4x8xf32, #tpu.memory_space<vmem>>, vector<4x8xf32>
    %cst_12 = arith.constant dense<0.000000e+00> : vector<4x32xf32>
    %29 = tpu.matmul %28, %27, %cst_12 {dimension_numbers = #tpu.dot_dimension_numbers<[1], [0], [0], [1], [0, 0, 1, 1], [], []>} : vector<4x8xf32>, vector<8x32xf32>, vector<4x32xf32> -> vector<4x32xf32>
    %c0_13 = arith.constant 0 : index
    %c0_14 = arith.constant 0 : index
    %c0_15 = arith.constant 0 : index
    %30 = vector.load %arg5[%c0_13, %c0_14, %c0_15] : memref<1x4x32xf32, #tpu.memory_space<vmem>>, vector<1x4x32xf32>
    %31 = vector.shape_cast %30 : vector<1x4x32xf32> to vector<4x32xf32>
    %32 = vector.shape_cast %29 : vector<4x32xf32> to vector<1x4x32xf32>
    tpu.vector_store %arg5[%c0_13, %c0_14, %c0_15], %32 {strides = array<i32>} : memref<1x4x32xf32, #tpu.memory_space<vmem>>, vector<1x4x32xf32>,
    return
  }
  func.func @transform_0(%arg0: i32) -> (i32, i32) {
    %c0_i32 = arith.constant 0 : i32
    %c0_i32_0 = arith.constant 0 : i32
    %c0_i32_1 = arith.constant 0 : i32
    return %c0_i32, %c0_i32_0 : i32, i32
  }
  func.func @transform_1(%arg0: i32) -> (i32, i32, i32) {
    %c0_i32 = arith.constant 0 : i32
    %c0_i32_0 = arith.constant 0 : i32
    %c0_i32_1 = arith.constant 0 : i32
    return %arg0, %c0_i32, %c0_i32_0 : i32, i32, i32
  }
  func.func @transform_2(%arg0: i32) -> (i32, i32) {
    %c0_i32 = arith.constant 0 : i32
    %c0_i32_0 = arith.constant 0 : i32
    %c0_i32_1 = arith.constant 0 : i32
    return %c0_i32, %c0_i32_0 : i32, i32
  }
  func.func @transform_3(%arg0: i32) -> (i32, i32) {
    %c0_i32 = arith.constant 0 : i32
    %c0_i32_0 = arith.constant 0 : i32
    %c0_i32_1 = arith.constant 0 : i32
    return %c0_i32, %c0_i32_0 : i32, i32
  }
  func.func @transform_4(%arg0: i32) -> (i32, i32, i32) {
    %c0_i32 = arith.constant 0 : i32
    %c0_i32_0 = arith.constant 0 : i32
    %c0_i32_1 = arith.constant 0 : i32
    return %arg0, %c0_i32, %c0_i32_0 : i32, i32, i32
  }
}

module attributes {stable_mosaic.version = 11 : i64} {
  func.func @encoder_layer_kernel(%arg0: i32, %arg1: memref<1x8x32xf32, #tpu.memory_space<vmem>>, %arg2: memref<1x32xf32, #tpu.memory_space<vmem>>, %arg3: memref<1x32xf32, #tpu.memory_space<vmem>>, %arg4: memref<32x96xbf16, #tpu.memory_space<vmem>>, %arg5: memref<1x96xf32, #tpu.memory_space<vmem>>, %arg6: memref<32x32xbf16, #tpu.memory_space<vmem>>, %arg7: memref<1x32xf32, #tpu.memory_space<vmem>>, %arg8: memref<1x32xf32, #tpu.memory_space<vmem>>, %arg9: memref<1x32xf32, #tpu.memory_space<vmem>>, %arg10: memref<32x64xbf16, #tpu.memory_space<vmem>>, %arg11: memref<1x64xf32, #tpu.memory_space<vmem>>, %arg12: memref<64x32xbf16, #tpu.memory_space<vmem>>, %arg13: memref<1x32xf32, #tpu.memory_space<vmem>>, %arg14: memref<1x8x32xf32, #tpu.memory_space<vmem>>) attributes {dimension_semantics = [#tpu.dimension_semantics<parallel>], iteration_bounds = array<i64: 2>, scalar_prefetch = 0 : i64, scratch_operands = 0 : i64, tpu.core_type = #tpu.core_type<tc>, window_params = [{transform_indices = @transform_0, window_bounds = array<i64: 1, 8, 32>}, {pipeline_mode = #tpu.pipeline_mode<synchronous>, transform_indices = @transform_1, window_bounds = array<i64: 1, 32>}, {pipeline_mode = #tpu.pipeline_mode<synchronous>, transform_indices = @transform_2, window_bounds = array<i64: 1, 32>}, {pipeline_mode = #tpu.pipeline_mode<synchronous>, transform_indices = @transform_3, window_bounds = array<i64: 32, 96>}, {pipeline_mode = #tpu.pipeline_mode<synchronous>, transform_indices = @transform_4, window_bounds = array<i64: 1, 96>}, {pipeline_mode = #tpu.pipeline_mode<synchronous>, transform_indices = @transform_5, window_bounds = array<i64: 32, 32>}, {pipeline_mode = #tpu.pipeline_mode<synchronous>, transform_indices = @transform_6, window_bounds = array<i64: 1, 32>}, {pipeline_mode = #tpu.pipeline_mode<synchronous>, transform_indices = @transform_7, window_bounds = array<i64: 1, 32>}, {pipeline_mode = #tpu.pipeline_mode<synchronous>, transform_indices = @transform_8, window_bounds = array<i64: 1, 32>}, {pipeline_mode = #tpu.pipeline_mode<synchronous>, transform_indices = @transform_9, window_bounds = array<i64: 32, 64>}, {pipeline_mode = #tpu.pipeline_mode<synchronous>, transform_indices = @transform_10, window_bounds = array<i64: 1, 64>}, {pipeline_mode = #tpu.pipeline_mode<synchronous>, transform_indices = @transform_11, window_bounds = array<i64: 64, 32>}, {pipeline_mode = #tpu.pipeline_mode<synchronous>, transform_indices = @transform_12, window_bounds = array<i64: 1, 32>}, {transform_indices = @transform_13, window_bounds = array<i64: 1, 8, 32>}]} {
    %c0 = arith.constant 0 : index
    %c0_0 = arith.constant 0 : index
    %c0_1 = arith.constant 0 : index
    %0 = vector.load %arg1[%c0, %c0_0, %c0_1] : memref<1x8x32xf32, #tpu.memory_space<vmem>>, vector<1x8x32xf32>
    %1 = vector.shape_cast %0 : vector<1x8x32xf32> to vector<8x32xf32>
    %c0_2 = arith.constant 0 : index
    %c0_3 = arith.constant 0 : index
    %2 = vector.load %arg2[%c0_2, %c0_3] : memref<1x32xf32, #tpu.memory_space<vmem>>, vector<1x32xf32>
    %c0_4 = arith.constant 0 : index
    %c0_5 = arith.constant 0 : index
    %3 = vector.load %arg3[%c0_4, %c0_5] : memref<1x32xf32, #tpu.memory_space<vmem>>, vector<1x32xf32>
    %cst = arith.constant dense<0.000000e+00> : vector<8xf32>
    %4 = vector.multi_reduction <add>, %1, %cst [1] : vector<8x32xf32> to vector<8xf32>
    %5 = vector.shape_cast %4 : vector<8xf32> to vector<8x1xf32>
    %cst_6 = arith.constant 3.200000e+01 : f32
    %6 = vector.broadcast %cst_6 : f32 to vector<8x1xf32>
    %7 = arith.divf %5, %6 : vector<8x1xf32>
    %8 = vector.broadcast %7 : vector<8x1xf32> to vector<8x32xf32>
    %9 = arith.subf %1, %8 : vector<8x32xf32>
    %10 = vector.broadcast %7 : vector<8x1xf32> to vector<8x32xf32>
    %11 = arith.subf %1, %10 : vector<8x32xf32>
    %12 = arith.mulf %9, %11 : vector<8x32xf32>
    %cst_7 = arith.constant dense<0.000000e+00> : vector<8xf32>
    %13 = vector.multi_reduction <add>, %12, %cst_7 [1] : vector<8x32xf32> to vector<8xf32>
    %14 = vector.shape_cast %13 : vector<8xf32> to vector<8x1xf32>
    %cst_8 = arith.constant 3.200000e+01 : f32
    %15 = vector.broadcast %cst_8 : f32 to vector<8x1xf32>
    %16 = arith.divf %14, %15 : vector<8x1xf32>
    %17 = vector.broadcast %7 : vector<8x1xf32> to vector<8x32xf32>
    %18 = arith.subf %1, %17 : vector<8x32xf32>
    %cst_9 = arith.constant 9.99999974E-6 : f32
    %19 = vector.broadcast %cst_9 : f32 to vector<8x1xf32>
    %20 = arith.addf %16, %19 : vector<8x1xf32>
    %21 = math.rsqrt %20 : vector<8x1xf32>
    %22 = vector.broadcast %21 : vector<8x1xf32> to vector<8x32xf32>
    %23 = arith.mulf %18, %22 : vector<8x32xf32>
    %24 = vector.broadcast %2 : vector<1x32xf32> to vector<8x32xf32>
    %25 = arith.mulf %23, %24 : vector<8x32xf32>
    %26 = vector.broadcast %3 : vector<1x32xf32> to vector<8x32xf32>
    %27 = arith.addf %25, %26 : vector<8x32xf32>
    %c0_10 = arith.constant 0 : index
    %c0_11 = arith.constant 0 : index
    %28 = vector.load %arg4[%c0_10, %c0_11] : memref<32x96xbf16, #tpu.memory_space<vmem>>, vector<32x96xbf16>
    %29 = arith.truncf %27 : vector<8x32xf32> to vector<8x32xbf16>
    %cst_12 = arith.constant dense<0.000000e+00> : vector<8x96xf32>
    %30 = tpu.matmul %29, %28, %cst_12 {dimension_numbers = #tpu.dot_dimension_numbers<[1], [0], [0], [1], [0, 0, 1, 1], [], []>} : vector<8x32xbf16>, vector<32x96xbf16>, vector<8x96xf32> -> vector<8x96xf32>
    %c0_13 = arith.constant 0 : index
    %c0_14 = arith.constant 0 : index
    %31 = vector.load %arg5[%c0_13, %c0_14] : memref<1x96xf32, #tpu.memory_space<vmem>>, vector<1x96xf32>
    %32 = vector.broadcast %31 : vector<1x96xf32> to vector<8x96xf32>
    %33 = arith.addf %30, %32 : vector<8x96xf32>
    %34 = vector.extract_strided_slice %33 {offsets = [0, 0], sizes = [8, 32], strides = [1, 1]} : vector<8x96xf32> to vector<8x32xf32>
    %cst_15 = arith.constant 0.353553385 : f32
    %35 = vector.broadcast %cst_15 : f32 to vector<8x32xf32>
    %36 = arith.mulf %34, %35 : vector<8x32xf32>
    %37 = vector.extract_strided_slice %36 {offsets = [0, 0], sizes = [8, 8], strides = [1, 1]} : vector<8x32xf32> to vector<8x8xf32>
    %38 = arith.truncf %37 : vector<8x8xf32> to vector<8x8xbf16>
    %39 = vector.extract_strided_slice %33 {offsets = [0, 32], sizes = [8, 8], strides = [1, 1]} : vector<8x96xf32> to vector<8x8xf32>
    %40 = arith.truncf %39 : vector<8x8xf32> to vector<8x8xbf16>
    %cst_16 = arith.constant dense<0.000000e+00> : vector<8x8xf32>
    %41 = tpu.matmul %38, %40, %cst_16 {dimension_numbers = #tpu.dot_dimension_numbers<[1], [1], [0], [0], [0, 0, 1, 0], [], []>} : vector<8x8xbf16>, vector<8x8xbf16>, vector<8x8xf32> -> vector<8x8xf32>
    %cst_17 = arith.constant dense<0xFF800000> : vector<8xf32>
    %42 = vector.multi_reduction <maximumf>, %41, %cst_17 [1] : vector<8x8xf32> to vector<8xf32>
    %43 = vector.shape_cast %42 : vector<8xf32> to vector<8x1xf32>
    %44 = vector.broadcast %43 : vector<8x1xf32> to vector<8x8xf32>
    %45 = arith.subf %41, %44 : vector<8x8xf32>
    %46 = math.exp %45 : vector<8x8xf32>
    %cst_18 = arith.constant dense<0.000000e+00> : vector<8xf32>
    %47 = vector.multi_reduction <add>, %46, %cst_18 [1] : vector<8x8xf32> to vector<8xf32>
    %48 = vector.shape_cast %47 : vector<8xf32> to vector<8x1xf32>
    %49 = tpu.reciprocal %48 {approx = true} : vector<8x1xf32> -> vector<8x1xf32>
    %50 = vector.broadcast %49 : vector<8x1xf32> to vector<8x8xf32>
    %51 = arith.mulf %46, %50 : vector<8x8xf32>
    %52 = vector.extract_strided_slice %33 {offsets = [0, 64], sizes = [8, 8], strides = [1, 1]} : vector<8x96xf32> to vector<8x8xf32>
    %53 = arith.truncf %51 : vector<8x8xf32> to vector<8x8xbf16>
    %54 = arith.truncf %52 : vector<8x8xf32> to vector<8x8xbf16>
    %cst_19 = arith.constant dense<0.000000e+00> : vector<8x8xf32>
    %55 = tpu.matmul %53, %54, %cst_19 {dimension_numbers = #tpu.dot_dimension_numbers<[1], [0], [0], [1], [0, 0, 1, 1], [], []>} : vector<8x8xbf16>, vector<8x8xbf16>, vector<8x8xf32> -> vector<8x8xf32>
    %56 = vector.extract_strided_slice %36 {offsets = [0, 8], sizes = [8, 8], strides = [1, 1]} : vector<8x32xf32> to vector<8x8xf32>
    %57 = arith.truncf %56 : vector<8x8xf32> to vector<8x8xbf16>
    %58 = vector.extract_strided_slice %33 {offsets = [0, 40], sizes = [8, 8], strides = [1, 1]} : vector<8x96xf32> to vector<8x8xf32>
    %59 = arith.truncf %58 : vector<8x8xf32> to vector<8x8xbf16>
    %cst_20 = arith.constant dense<0.000000e+00> : vector<8x8xf32>
    %60 = tpu.matmul %57, %59, %cst_20 {dimension_numbers = #tpu.dot_dimension_numbers<[1], [1], [0], [0], [0, 0, 1, 0], [], []>} : vector<8x8xbf16>, vector<8x8xbf16>, vector<8x8xf32> -> vector<8x8xf32>
    %cst_21 = arith.constant dense<0xFF800000> : vector<8xf32>
    %61 = vector.multi_reduction <maximumf>, %60, %cst_21 [1] : vector<8x8xf32> to vector<8xf32>
    %62 = vector.shape_cast %61 : vector<8xf32> to vector<8x1xf32>
    %63 = vector.broadcast %62 : vector<8x1xf32> to vector<8x8xf32>
    %64 = arith.subf %60, %63 : vector<8x8xf32>
    %65 = math.exp %64 : vector<8x8xf32>
    %cst_22 = arith.constant dense<0.000000e+00> : vector<8xf32>
    %66 = vector.multi_reduction <add>, %65, %cst_22 [1] : vector<8x8xf32> to vector<8xf32>
    %67 = vector.shape_cast %66 : vector<8xf32> to vector<8x1xf32>
    %68 = tpu.reciprocal %67 {approx = true} : vector<8x1xf32> -> vector<8x1xf32>
    %69 = vector.broadcast %68 : vector<8x1xf32> to vector<8x8xf32>
    %70 = arith.mulf %65, %69 : vector<8x8xf32>
    %71 = vector.extract_strided_slice %33 {offsets = [0, 72], sizes = [8, 8], strides = [1, 1]} : vector<8x96xf32> to vector<8x8xf32>
    %72 = arith.truncf %70 : vector<8x8xf32> to vector<8x8xbf16>
    %73 = arith.truncf %71 : vector<8x8xf32> to vector<8x8xbf16>
    %cst_23 = arith.constant dense<0.000000e+00> : vector<8x8xf32>
    %74 = tpu.matmul %72, %73, %cst_23 {dimension_numbers = #tpu.dot_dimension_numbers<[1], [0], [0], [1], [0, 0, 1, 1], [], []>} : vector<8x8xbf16>, vector<8x8xbf16>, vector<8x8xf32> -> vector<8x8xf32>
    %75 = vector.extract_strided_slice %36 {offsets = [0, 16], sizes = [8, 8], strides = [1, 1]} : vector<8x32xf32> to vector<8x8xf32>
    %76 = arith.truncf %75 : vector<8x8xf32> to vector<8x8xbf16>
    %77 = vector.extract_strided_slice %33 {offsets = [0, 48], sizes = [8, 8], strides = [1, 1]} : vector<8x96xf32> to vector<8x8xf32>
    %78 = arith.truncf %77 : vector<8x8xf32> to vector<8x8xbf16>
    %cst_24 = arith.constant dense<0.000000e+00> : vector<8x8xf32>
    %79 = tpu.matmul %76, %78, %cst_24 {dimension_numbers = #tpu.dot_dimension_numbers<[1], [1], [0], [0], [0, 0, 1, 0], [], []>} : vector<8x8xbf16>, vector<8x8xbf16>, vector<8x8xf32> -> vector<8x8xf32>
    %cst_25 = arith.constant dense<0xFF800000> : vector<8xf32>
    %80 = vector.multi_reduction <maximumf>, %79, %cst_25 [1] : vector<8x8xf32> to vector<8xf32>
    %81 = vector.shape_cast %80 : vector<8xf32> to vector<8x1xf32>
    %82 = vector.broadcast %81 : vector<8x1xf32> to vector<8x8xf32>
    %83 = arith.subf %79, %82 : vector<8x8xf32>
    %84 = math.exp %83 : vector<8x8xf32>
    %cst_26 = arith.constant dense<0.000000e+00> : vector<8xf32>
    %85 = vector.multi_reduction <add>, %84, %cst_26 [1] : vector<8x8xf32> to vector<8xf32>
    %86 = vector.shape_cast %85 : vector<8xf32> to vector<8x1xf32>
    %87 = tpu.reciprocal %86 {approx = true} : vector<8x1xf32> -> vector<8x1xf32>
    %88 = vector.broadcast %87 : vector<8x1xf32> to vector<8x8xf32>
    %89 = arith.mulf %84, %88 : vector<8x8xf32>
    %90 = vector.extract_strided_slice %33 {offsets = [0, 80], sizes = [8, 8], strides = [1, 1]} : vector<8x96xf32> to vector<8x8xf32>
    %91 = arith.truncf %89 : vector<8x8xf32> to vector<8x8xbf16>
    %92 = arith.truncf %90 : vector<8x8xf32> to vector<8x8xbf16>
    %cst_27 = arith.constant dense<0.000000e+00> : vector<8x8xf32>
    %93 = tpu.matmul %91, %92, %cst_27 {dimension_numbers = #tpu.dot_dimension_numbers<[1], [0], [0], [1], [0, 0, 1, 1], [], []>} : vector<8x8xbf16>, vector<8x8xbf16>, vector<8x8xf32> -> vector<8x8xf32>
    %94 = vector.extract_strided_slice %36 {offsets = [0, 24], sizes = [8, 8], strides = [1, 1]} : vector<8x32xf32> to vector<8x8xf32>
    %95 = arith.truncf %94 : vector<8x8xf32> to vector<8x8xbf16>
    %96 = vector.extract_strided_slice %33 {offsets = [0, 56], sizes = [8, 8], strides = [1, 1]} : vector<8x96xf32> to vector<8x8xf32>
    %97 = arith.truncf %96 : vector<8x8xf32> to vector<8x8xbf16>
    %cst_28 = arith.constant dense<0.000000e+00> : vector<8x8xf32>
    %98 = tpu.matmul %95, %97, %cst_28 {dimension_numbers = #tpu.dot_dimension_numbers<[1], [1], [0], [0], [0, 0, 1, 0], [], []>} : vector<8x8xbf16>, vector<8x8xbf16>, vector<8x8xf32> -> vector<8x8xf32>
    %cst_29 = arith.constant dense<0xFF800000> : vector<8xf32>
    %99 = vector.multi_reduction <maximumf>, %98, %cst_29 [1] : vector<8x8xf32> to vector<8xf32>
    %100 = vector.shape_cast %99 : vector<8xf32> to vector<8x1xf32>
    %101 = vector.broadcast %100 : vector<8x1xf32> to vector<8x8xf32>
    %102 = arith.subf %98, %101 : vector<8x8xf32>
    %103 = math.exp %102 : vector<8x8xf32>
    %cst_30 = arith.constant dense<0.000000e+00> : vector<8xf32>
    %104 = vector.multi_reduction <add>, %103, %cst_30 [1] : vector<8x8xf32> to vector<8xf32>
    %105 = vector.shape_cast %104 : vector<8xf32> to vector<8x1xf32>
    %106 = tpu.reciprocal %105 {approx = true} : vector<8x1xf32> -> vector<8x1xf32>
    %107 = vector.broadcast %106 : vector<8x1xf32> to vector<8x8xf32>
    %108 = arith.mulf %103, %107 : vector<8x8xf32>
    %109 = vector.extract_strided_slice %33 {offsets = [0, 88], sizes = [8, 8], strides = [1, 1]} : vector<8x96xf32> to vector<8x8xf32>
    %110 = arith.truncf %108 : vector<8x8xf32> to vector<8x8xbf16>
    %111 = arith.truncf %109 : vector<8x8xf32> to vector<8x8xbf16>
    %cst_31 = arith.constant dense<0.000000e+00> : vector<8x8xf32>
    %112 = tpu.matmul %110, %111, %cst_31 {dimension_numbers = #tpu.dot_dimension_numbers<[1], [0], [0], [1], [0, 0, 1, 1], [], []>} : vector<8x8xbf16>, vector<8x8xbf16>, vector<8x8xf32> -> vector<8x8xf32>
    %113 = tpu.concatenate %55, %74, %93, %112 in 1 : vector<8x8xf32>, vector<8x8xf32>, vector<8x8xf32>, vector<8x8xf32> -> vector<8x32xf32>
    %c0_32 = arith.constant 0 : index
    %c0_33 = arith.constant 0 : index
    %114 = vector.load %arg6[%c0_32, %c0_33] : memref<32x32xbf16, #tpu.memory_space<vmem>>, vector<32x32xbf16>
    %115 = arith.truncf %113 : vector<8x32xf32> to vector<8x32xbf16>
    %cst_34 = arith.constant dense<0.000000e+00> : vector<8x32xf32>
    %116 = tpu.matmul %115, %114, %cst_34 {dimension_numbers = #tpu.dot_dimension_numbers<[1], [0], [0], [1], [0, 0, 1, 1], [], []>} : vector<8x32xbf16>, vector<32x32xbf16>, vector<8x32xf32> -> vector<8x32xf32>
    %117 = arith.addf %1, %116 : vector<8x32xf32>
    %c0_35 = arith.constant 0 : index
    %c0_36 = arith.constant 0 : index
    %118 = vector.load %arg7[%c0_35, %c0_36] : memref<1x32xf32, #tpu.memory_space<vmem>>, vector<1x32xf32>
    %119 = vector.broadcast %118 : vector<1x32xf32> to vector<8x32xf32>
    %120 = arith.addf %117, %119 : vector<8x32xf32>
    %c0_37 = arith.constant 0 : index
    %c0_38 = arith.constant 0 : index
    %121 = vector.load %arg8[%c0_37, %c0_38] : memref<1x32xf32, #tpu.memory_space<vmem>>, vector<1x32xf32>
    %c0_39 = arith.constant 0 : index
    %c0_40 = arith.constant 0 : index
    %122 = vector.load %arg9[%c0_39, %c0_40] : memref<1x32xf32, #tpu.memory_space<vmem>>, vector<1x32xf32>
    %cst_41 = arith.constant dense<0.000000e+00> : vector<8xf32>
    %123 = vector.multi_reduction <add>, %120, %cst_41 [1] : vector<8x32xf32> to vector<8xf32>
    %124 = vector.shape_cast %123 : vector<8xf32> to vector<8x1xf32>
    %cst_42 = arith.constant 3.200000e+01 : f32
    %125 = vector.broadcast %cst_42 : f32 to vector<8x1xf32>
    %126 = arith.divf %124, %125 : vector<8x1xf32>
    %127 = vector.broadcast %126 : vector<8x1xf32> to vector<8x32xf32>
    %128 = arith.subf %120, %127 : vector<8x32xf32>
    %129 = vector.broadcast %126 : vector<8x1xf32> to vector<8x32xf32>
    %130 = arith.subf %120, %129 : vector<8x32xf32>
    %131 = arith.mulf %128, %130 : vector<8x32xf32>
    %cst_43 = arith.constant dense<0.000000e+00> : vector<8xf32>
    %132 = vector.multi_reduction <add>, %131, %cst_43 [1] : vector<8x32xf32> to vector<8xf32>
    %133 = vector.shape_cast %132 : vector<8xf32> to vector<8x1xf32>
    %cst_44 = arith.constant 3.200000e+01 : f32
    %134 = vector.broadcast %cst_44 : f32 to vector<8x1xf32>
    %135 = arith.divf %133, %134 : vector<8x1xf32>
    %136 = vector.broadcast %126 : vector<8x1xf32> to vector<8x32xf32>
    %137 = arith.subf %120, %136 : vector<8x32xf32>
    %cst_45 = arith.constant 9.99999974E-6 : f32
    %138 = vector.broadcast %cst_45 : f32 to vector<8x1xf32>
    %139 = arith.addf %135, %138 : vector<8x1xf32>
    %140 = math.rsqrt %139 : vector<8x1xf32>
    %141 = vector.broadcast %140 : vector<8x1xf32> to vector<8x32xf32>
    %142 = arith.mulf %137, %141 : vector<8x32xf32>
    %143 = vector.broadcast %121 : vector<1x32xf32> to vector<8x32xf32>
    %144 = arith.mulf %142, %143 : vector<8x32xf32>
    %145 = vector.broadcast %122 : vector<1x32xf32> to vector<8x32xf32>
    %146 = arith.addf %144, %145 : vector<8x32xf32>
    %c0_46 = arith.constant 0 : index
    %c0_47 = arith.constant 0 : index
    %147 = vector.load %arg10[%c0_46, %c0_47] : memref<32x64xbf16, #tpu.memory_space<vmem>>, vector<32x64xbf16>
    %148 = arith.truncf %146 : vector<8x32xf32> to vector<8x32xbf16>
    %cst_48 = arith.constant dense<0.000000e+00> : vector<8x64xf32>
    %149 = tpu.matmul %148, %147, %cst_48 {dimension_numbers = #tpu.dot_dimension_numbers<[1], [0], [0], [1], [0, 0, 1, 1], [], []>} : vector<8x32xbf16>, vector<32x64xbf16>, vector<8x64xf32> -> vector<8x64xf32>
    %c0_49 = arith.constant 0 : index
    %c0_50 = arith.constant 0 : index
    %150 = vector.load %arg11[%c0_49, %c0_50] : memref<1x64xf32, #tpu.memory_space<vmem>>, vector<1x64xf32>
    %151 = vector.broadcast %150 : vector<1x64xf32> to vector<8x64xf32>
    %152 = arith.addf %149, %151 : vector<8x64xf32>
    %cst_51 = arith.constant 5.000000e-01 : f32
    %153 = vector.broadcast %cst_51 : f32 to vector<8x64xf32>
    %154 = arith.mulf %153, %152 : vector<8x64xf32>
    %cst_52 = arith.constant 4.471500e-02 : f32
    %155 = vector.broadcast %cst_52 : f32 to vector<8x64xf32>
    %156 = arith.mulf %155, %152 : vector<8x64xf32>
    %157 = arith.mulf %156, %152 : vector<8x64xf32>
    %158 = arith.mulf %157, %152 : vector<8x64xf32>
    %159 = arith.addf %152, %158 : vector<8x64xf32>
    %cst_53 = arith.constant 0.797884583 : f32
    %160 = vector.broadcast %cst_53 : f32 to vector<8x64xf32>
    %161 = arith.mulf %160, %159 : vector<8x64xf32>
    %162 = math.tanh %161 : vector<8x64xf32>
    %cst_54 = arith.constant 1.000000e+00 : f32
    %163 = vector.broadcast %cst_54 : f32 to vector<8x64xf32>
    %164 = arith.addf %163, %162 : vector<8x64xf32>
    %165 = arith.mulf %154, %164 : vector<8x64xf32>
    %c0_55 = arith.constant 0 : index
    %c0_56 = arith.constant 0 : index
    %166 = vector.load %arg12[%c0_55, %c0_56] : memref<64x32xbf16, #tpu.memory_space<vmem>>, vector<64x32xbf16>
    %167 = arith.truncf %165 : vector<8x64xf32> to vector<8x64xbf16>
    %cst_57 = arith.constant dense<0.000000e+00> : vector<8x32xf32>
    %168 = tpu.matmul %167, %166, %cst_57 {dimension_numbers = #tpu.dot_dimension_numbers<[1], [0], [0], [1], [0, 0, 1, 1], [], []>} : vector<8x64xbf16>, vector<64x32xbf16>, vector<8x32xf32> -> vector<8x32xf32>
    %169 = arith.addf %120, %168 : vector<8x32xf32>
    %c0_58 = arith.constant 0 : index
    %c0_59 = arith.constant 0 : index
    %170 = vector.load %arg13[%c0_58, %c0_59] : memref<1x32xf32, #tpu.memory_space<vmem>>, vector<1x32xf32>
    %171 = vector.broadcast %170 : vector<1x32xf32> to vector<8x32xf32>
    %172 = arith.addf %169, %171 : vector<8x32xf32>
    %c0_60 = arith.constant 0 : index
    %c0_61 = arith.constant 0 : index
    %c0_62 = arith.constant 0 : index
    %173 = vector.load %arg14[%c0_60, %c0_61, %c0_62] : memref<1x8x32xf32, #tpu.memory_space<vmem>>, vector<1x8x32xf32>
    %174 = vector.shape_cast %173 : vector<1x8x32xf32> to vector<8x32xf32>
    %175 = vector.shape_cast %172 : vector<8x32xf32> to vector<1x8x32xf32>
    tpu.vector_store %arg14[%c0_60, %c0_61, %c0_62], %175 {strides = array<i32>} : memref<1x8x32xf32, #tpu.memory_space<vmem>>, vector<1x8x32xf32>,
    return
  }
  func.func @transform_0(%arg0: i32) -> (i32, i32, i32) {
    %c0_i32 = arith.constant 0 : i32
    %c0_i32_0 = arith.constant 0 : i32
    %c0_i32_1 = arith.constant 0 : i32
    return %arg0, %c0_i32, %c0_i32_0 : i32, i32, i32
  }
  func.func @transform_1(%arg0: i32) -> (i32, i32) {
    %c0_i32 = arith.constant 0 : i32
    %c0_i32_0 = arith.constant 0 : i32
    %c0_i32_1 = arith.constant 0 : i32
    return %c0_i32, %c0_i32_0 : i32, i32
  }
  func.func @transform_2(%arg0: i32) -> (i32, i32) {
    %c0_i32 = arith.constant 0 : i32
    %c0_i32_0 = arith.constant 0 : i32
    %c0_i32_1 = arith.constant 0 : i32
    return %c0_i32, %c0_i32_0 : i32, i32
  }
  func.func @transform_3(%arg0: i32) -> (i32, i32) {
    %c0_i32 = arith.constant 0 : i32
    %c0_i32_0 = arith.constant 0 : i32
    %c0_i32_1 = arith.constant 0 : i32
    return %c0_i32, %c0_i32_0 : i32, i32
  }
  func.func @transform_4(%arg0: i32) -> (i32, i32) {
    %c0_i32 = arith.constant 0 : i32
    %c0_i32_0 = arith.constant 0 : i32
    %c0_i32_1 = arith.constant 0 : i32
    return %c0_i32, %c0_i32_0 : i32, i32
  }
  func.func @transform_5(%arg0: i32) -> (i32, i32) {
    %c0_i32 = arith.constant 0 : i32
    %c0_i32_0 = arith.constant 0 : i32
    %c0_i32_1 = arith.constant 0 : i32
    return %c0_i32, %c0_i32_0 : i32, i32
  }
  func.func @transform_6(%arg0: i32) -> (i32, i32) {
    %c0_i32 = arith.constant 0 : i32
    %c0_i32_0 = arith.constant 0 : i32
    %c0_i32_1 = arith.constant 0 : i32
    return %c0_i32, %c0_i32_0 : i32, i32
  }
  func.func @transform_7(%arg0: i32) -> (i32, i32) {
    %c0_i32 = arith.constant 0 : i32
    %c0_i32_0 = arith.constant 0 : i32
    %c0_i32_1 = arith.constant 0 : i32
    return %c0_i32, %c0_i32_0 : i32, i32
  }
  func.func @transform_8(%arg0: i32) -> (i32, i32) {
    %c0_i32 = arith.constant 0 : i32
    %c0_i32_0 = arith.constant 0 : i32
    %c0_i32_1 = arith.constant 0 : i32
    return %c0_i32, %c0_i32_0 : i32, i32
  }
  func.func @transform_9(%arg0: i32) -> (i32, i32) {
    %c0_i32 = arith.constant 0 : i32
    %c0_i32_0 = arith.constant 0 : i32
    %c0_i32_1 = arith.constant 0 : i32
    return %c0_i32, %c0_i32_0 : i32, i32
  }
  func.func @transform_10(%arg0: i32) -> (i32, i32) {
    %c0_i32 = arith.constant 0 : i32
    %c0_i32_0 = arith.constant 0 : i32
    %c0_i32_1 = arith.constant 0 : i32
    return %c0_i32, %c0_i32_0 : i32, i32
  }
  func.func @transform_11(%arg0: i32) -> (i32, i32) {
    %c0_i32 = arith.constant 0 : i32
    %c0_i32_0 = arith.constant 0 : i32
    %c0_i32_1 = arith.constant 0 : i32
    return %c0_i32, %c0_i32_0 : i32, i32
  }
  func.func @transform_12(%arg0: i32) -> (i32, i32) {
    %c0_i32 = arith.constant 0 : i32
    %c0_i32_0 = arith.constant 0 : i32
    %c0_i32_1 = arith.constant 0 : i32
    return %c0_i32, %c0_i32_0 : i32, i32
  }
  func.func @transform_13(%arg0: i32) -> (i32, i32, i32) {
    %c0_i32 = arith.constant 0 : i32
    %c0_i32_0 = arith.constant 0 : i32
    %c0_i32_1 = arith.constant 0 : i32
    return %arg0, %c0_i32, %c0_i32_0 : i32, i32, i32
  }
}

</mosaic_0001>

<bundles_post_ra>
// kernel: whisper_forward.5
= control target key start
LH: loop header
LB: loop body
LE: loop exit
PB: predicated region body
PF: predicated region fallthrough
CT: control target
= control target key end

     0   :  { %s393_s12 = smov 0   ;;  %s426_s0 = inlined_call_operand.vmem [shape: f32[2,16,24], index: 0, kind: input, shape index: {}]   ;;  %s427_s1 = inlined_call_operand.vmem [shape: bf16[24,32], index: 1, kind: input, shape index: {}]   ;;  %s428_s2 = inlined_call_operand.vmem [shape: f32[1,32], index: 2, kind: input, shape index: {}]   ;;  %s429_s3 = inlined_call_operand.vmem [shape: f32[2,16,32], index: 3, kind: output, shape index: {}]  }
   0x1 LB: > { %s319_s13 = sadd.s32 4294967295, %s369_s12   ;;  %p323_p0 = scmp.ge.s32.totalorder %s369_s12, 1  ;;  %s369_s12 = sphi %s393_s12, %s13_s12  }
   0x2   : > { %p137_p1 = scmp.lt.s32.totalorder %s369_s12, 3 }
   0x4   : > { %p138_p2 = pnand %p323_p0, %p137_p1 }
   0x5   : > { %v357_v0 = vld [vmem:[%s427_s1] sm:$0xff] (!%p138_p2)   ;;  %v371_v1 = vmov (!%p138_p2), 0.0   ;;  %v358_v2 = vld [vmem:[%s427_s1 + $0x8] ss:$0 sps:$4 sm:$0xff] (!%p138_p2)   ;;  %vm198_vm0 = vcmask (!%p138_p2), 1043456   ;;  %vm372_vm1 = vmmov (!%p138_p2), 0  }
   0x6   : > { %141 = sbr.rel (%p138_p2) target bundleno = 261 (0x105), region = 32  ;;  %339 = vmatprep.subr.bf16.mxu0 (!%p138_p2), %v371_v1  ;;  %343 = vmatprep.mubr.msk.bf16.mxu0 (!%p138_p2), %vm372_vm1, %v371_v1  ;;  %p161_p3 = scmp.lt.s32.totalorder (!%p138_p2), %s319_s13, 1  ;;  %v200_v3 = vsel (!%p138_p2), %vm198_vm0, %v358_v2, 0  ;;  %vm194_vm2 = vcmask (!%p138_p2), 195584   ;;  %v328_v7 = vld [vmem:[%s428_s2] ss:$0 sm:$0xff] (!%p138_p2) }
   0x7   : > { %340 = vmatpush3.bf16.msra.mxu0 (!%p138_p2), %v357_v0  ;;  %vm261_vm3 = vcmask (!%p138_p2), 261120  }
   0x8   : > { %341 = vmatprep.subr.bf16.mxu0 (!%p138_p2), %v371_v1 }
   0xb   : > { %342 = vmatpush3.bf16.msra.mxu0 (!%p138_p2), %v200_v3 }
   0xd   : > { %s431_s13 = smov (!%p161_p3, %s319_s13), 1 }
   0xe   : > { %s334_s18 = sshll.u32 %s431_s13, 4 }
   0xf   : > { %s165_s21 = scalar_lea.vmem %s426_s0, %s334_s18  ;;  %s170_s26 = scalar_lea.vmem %s429_s3, %s334_s18 }
  0x10   : > { %v172_v4 = vld [vmem:[%s165_s21] sm:$0xff]  ;;  %v173_v5 = vld [vmem:[%s165_s21 + $0x8] sm:$0xff] }
  0x11   : > { %v177_v6 = vpack.c.bf16 %v173_v5, %v172_v4 }
  0x13   : > { %344 = vmatmul.mubr.msk.bf16.vlgmr.msra.gmra.mrb[0].mxu0 %vm194_vm2, %v177_v6 }
  0xe6   : > { %v236_v8 = vpop.f32.mrb[0].mxu0 }
  0xe7   : > { %v237_v9 = vadd.f32 %v328_v7, %v236_v8  ;;  %v345_v10 = vpop.f32.mrb[1].mxu0 }
  0xe8   : > { %v239_v11 = vpop.f32.mrb[2].mxu0 }
  0xe9   : > { %v245_v12 = vmul.f32 0.044715, %v237_v9  ;;  %v240_v13 = vadd.f32 %v328_v7, %v239_v11  ;;  %v346_v14 = vpop.f32.mrb[3].mxu0  ;;  %v243_v25 = vmul.f32 0.5, %v237_v9 }
  0xeb   : > { %v247_v15 = vmul.f32 %v245_v12, %v237_v9  ;;  %v246_v16 = vmul.f32 0.044715, %v240_v13  ;;  %v244_v29 = vmul.f32 0.5, %v240_v13 }
  0xed   : > { %v249_v17 = vmul.f32 %v247_v15, %v237_v9  ;;  %v248_v18 = vmul.f32 %v246_v16, %v240_v13 }
  0xef   : > { %v251_v19 = vadd.f32 %v249_v17, %v237_v9  ;;  %v250_v20 = vmul.f32 %v248_v18, %v240_v13 }
  0xf1   : > { %v253_v21 = vmul.f32 0.7978846, %v251_v19  ;;  %v252_v22 = vadd.f32 %v250_v20, %v240_v13 }
  0xf3   : > { %359 = vtanh.f32 %v253_v21  ;;  %v254_v23 = vmul.f32 0.7978846, %v252_v22 }
  0xf5   : > { %361 = vtanh.f32 %v254_v23 }
  0xfd   : > { %v360_v24 = vpop.eup %359 }
  0xfe   : > { %v257_v26 = vadd.f32 1.0, %v360_v24 }
  0xff   : > { %v362_v27 = vpop.eup %361 }
 0x100   : > { %v259_v28 = vmul.f32 %v257_v26, %v243_v25  ;;  %v258_v30 = vadd.f32 1.0, %v362_v27 }
 0x102   : > { %262 = vst.msk [vmem:[%s170_s26] sm:$0xff] %vm261_vm3, %v259_v28  ;;  %v260_v31 = vmul.f32 %v258_v30, %v244_v29 }
 0x104   : > { %263 = vst.msk [vmem:[%s170_s26 + $0x8] sm:$0xff] %vm261_vm3, %v260_v31 }
 0x105 PF: > { %s13_s12 = sadd.s32 1, %s369_s12  }
 0x106   : > { %p10_p4 = scmp.ge.s32.totalorder %s13_s12, 4  }
 0x108   :  { %12 = sbr.rel (!%p10_p4) target bundleno = 1 (0x1), region = 62 }

// kernel: whisper_forward.6
= control target key start
LH: loop header
LB: loop body
LE: loop exit
PB: predicated region body
PF: predicated region fallthrough
CT: control target
= control target key end

     0   :  { %s454_s15 = smov 0   ;;  %s502_s0 = inlined_call_operand.vmem [shape: f32[2,8,96], index: 0, kind: input, shape index: {}]   ;;  %s503_s1 = inlined_call_operand.vmem [shape: bf16[96,32], index: 1, kind: input, shape index: {}]   ;;  %s504_s2 = inlined_call_operand.vmem [shape: f32[1,32], index: 2, kind: input, shape index: {}]   ;;  %s505_s3 = inlined_call_operand.vmem [shape: f32[8,32], index: 3, kind: input, shape index: {}]   ;;  %s506_s4 = inlined_call_operand.vmem [shape: f32[2,8,32], index: 4, kind: output, shape index: {}]  }
   0x1 LB: > { %s361_s16 = sadd.s32 4294967295, %s425_s15   ;;  %p365_p0 = scmp.ge.s32.totalorder %s425_s15, 1  ;;  %s425_s15 = sphi %s454_s15, %s14_s15  }
   0x2   : > { %p161_p1 = scmp.lt.s32.totalorder %s425_s15, 3 }
   0x4   : > { %p162_p2 = pnand %p365_p0, %p161_p1 }
   0x5   : > { %v411_v0 = vld [vmem:[%s503_s1] sm:$0xff] (!%p162_p2)   ;;  %v427_v1 = vmov (!%p162_p2), 0.0   ;;  %v412_v2 = vld [vmem:[%s503_s1 + $0x8] sm:$0xff] (!%p162_p2)   ;;  %vm428_vm0 = vmmov (!%p162_p2), 0   ;;  %p185_p3 = scmp.lt.s32.totalorder (!%p162_p2), %s361_s16, 1  ;;  %v413_v3 = vld [vmem:[%s503_s1 + $0x10] sm:$0xff] (!%p162_p2)  }
   0x6   : > { %165 = sbr.rel (%p162_p2) target bundleno = 272 (0x110), region = 36  ;;  %385 = vmatprep.subr.bf16.mxu0 (!%p162_p2), %v427_v1  ;;  %397 = vmatprep.mubr.msk.bf16.mxu0 (!%p162_p2), %vm428_vm0, %v427_v1  ;;  %v414_v4 = vld [vmem:[%s503_s1 + $0x18] sm:$0xff] (!%p162_p2)   ;;  %v415_v5 = vld [vmem:[%s503_s1 + $0x20] sm:$0xff] (!%p162_p2)   ;;  %v416_v6 = vld [vmem:[%s503_s1 + $0x28] sm:$0xff] (!%p162_p2)   ;;  %vm251_vm1 = vcmask (!%p162_p2), 785408   ;;  %vm306_vm2 = vcmask (!%p162_p2), 261120  }
   0x7   : > { %386 = vmatpush3.bf16.msra.mxu0 (!%p162_p2), %v411_v0  ;;  %v368_v9 = vld [vmem:[%s504_s2] ss:$0 sm:$0xff] (!%p162_p2) }
   0x8   : > { %387 = vmatprep.subr.bf16.mxu0 (!%p162_p2), %v427_v1  ;;  %v304_v23 = vld [vmem:[%s505_s3] sm:$0xff] (!%p162_p2) }
   0xb   : > { %388 = vmatpush3.bf16.msra.mxu0 (!%p162_p2), %v412_v2 }
   0xc   : > { %389 = vmatprep.subr.bf16.mxu0 (!%p162_p2), %v427_v1 }
   0xd   : > { %s508_s16 = smov (!%p185_p3, %s361_s16), 1 }
   0xe   : > { %s366_s25 = sshll.u32 %s508_s16, 3 }
   0xf   : > { %390 = vmatpush3.bf16.msra.mxu0 %v413_v3  ;;  %s188_s30 = scalar_lea.vmem %s502_s0, %s366_s25  ;;  %s192_s13 = scalar_lea.vmem %s506_s4, %s366_s25 }
  0x10   : > { %391 = vmatprep.subr.bf16.mxu0 %v427_v1  ;;  %v194_v7 = vld [vmem:[%s188_s30] sm:$0xff] }
  0x11   : > { %v207_v8 = vpack.c.bf16 %v194_v7, %v194_v7 }
  0x13   : > { %392 = vmatpush3.bf16.msra.mxu0 %v414_v4 }
  0x14   : > { %393 = vmatprep.subr.bf16.mxu0 %v427_v1 }
  0x17   : > { %394 = vmatpush3.bf16.msra.mxu0 %v415_v5 }
  0x18   : > { %395 = vmatprep.subr.bf16.mxu0 %v427_v1 }
  0x1b   : > { %396 = vmatpush3.bf16.msra.mxu0 %v416_v6 }
  0x1e   : > { %398 = vmatmul.mubr.msk.bf16.vlgmr.msra.gmra.mrb[0].mxu0 %vm251_vm1, %v207_v8 }
  0xf1   : > { %v289_v10 = vpop.f32.mrb[0].mxu0 }
  0xf2   : > { %v290_v11 = vadd.f32 %v368_v9, %v289_v10  ;;  %v399_v12 = vpop.f32.mrb[1].mxu0 }
  0xf3   : > { %v292_v13 = vpop.f32.mrb[2].mxu0 }
  0xf4   : > { %v296_v14 = vmul.f32 0.044715, %v290_v11  ;;  %v400_v15 = vpop.f32.mrb[3].mxu0  ;;  %v295_v21 = vmul.f32 0.5, %v290_v11 }
  0xf6   : > { %v297_v16 = vmul.f32 %v296_v14, %v290_v11 }
  0xf8   : > { %v298_v17 = vmul.f32 %v297_v16, %v290_v11 }
  0xfa   : > { %v299_v18 = vadd.f32 %v298_v17, %v290_v11 }
  0xfc   : > { %v300_v19 = vmul.f32 0.7978846, %v299_v18 }
  0xfe   : > { %417 = vtanh.f32 %v300_v19 }
 0x108   : > { %v418_v20 = vpop.eup %417 }
 0x109   : > { %v302_v22 = vadd.f32 1.0, %v418_v20 }
 0x10b   : > { %v303_v24 = vmul.f32 %v302_v22, %v295_v21 }
 0x10d   : > { %v305_v25 = vadd.f32 %v304_v23, %v303_v24 }
 0x10f   : > { %307 = vst.msk [vmem:[%s192_s13] sm:$0xff] %vm306_vm2, %v305_v25 }
 0x110 PF: > { %s14_s15 = sadd.s32 1, %s425_s15  }
 0x111   : > { %p11_p4 = scmp.ge.s32.totalorder %s14_s15, 4  }
 0x113   :  { %13 = sbr.rel (!%p11_p4) target bundleno = 1 (0x1), region = 66 }

// kernel: whisper_forward.9
= control target key start
LH: loop header
LB: loop body
LE: loop exit
PB: predicated region body
PF: predicated region fallthrough
CT: control target
= control target key end

     0   :  { %9 = vsyncpa [#allocation3], 0  ;;  %s639_s0 = inlined_call_operand.vmem [shape: f32[4,8], index: 0, kind: input, shape index: {}]   ;;  %s640_s1 = inlined_call_operand.vmem [shape: f32[2,8,32], index: 1, kind: input, shape index: {}]   ;;  %s641_s2 = inlined_call_operand.vmem [shape: f32[1,32], index: 2, kind: input, shape index: {}]   ;;  %s642_s3 = inlined_call_operand.vmem [shape: f32[1,32], index: 3, kind: input, shape index: {}]   ;;  %s643_s4 = inlined_call_operand.hbm [shape: f32[2,4,32], index: 4, kind: output, shape index: {}]  }
   0x1   :  { %11 = vsyncpa [#allocation3 + $0x1], 0  ;;  %s530_s15 = smov 0   ;;  %s532_s16 = smov 0  }
   0x2   :  { %s534_s17 = smov 0   ;;  %s536_s18 = smov 0  }
   0x3 LB: > { %s551_s19 = sadd.s32 4294967295, %s500_s18   ;;  %s375_s20 = sadd.s32 4294967294, %s500_s18   ;;  %s500_s18 = sphi %s536_s18, %s649_s18   ;;  %s496_s17 = sphi %s534_s17, %s648_s17   ;;  %s492_s16 = sphi %s532_s16, %s647_s16   ;;  %s488_s15 = sphi %s530_s15, %s646_s15  }
   0x4   : > { %s555_s21 = sadd.s32 1, %s500_s18   ;;  %s113_s22 = sadd.s32 1, %s496_s17 }
   0x5   : > { %s110_s23 = ssub.s32 %s500_s18, %s555_s21  ;;  %p123_p0 = scmp.ne.s32.totalorder %s496_s17, %s492_s16 }
   0x6   : > { %p111_p1 = scmp.eq.s32.totalorder %s110_s23, 0  ;;  %p124_p2 = scmp.eq.s32.totalorder %s551_s19, 1 }
   0x7   : > { %p129_p3 = scmp.ne.s32.totalorder %s492_s16, %s488_s15  ;;  %p130_p4 = scmp.eq.s32.totalorder %s375_s20, 1 }
   0x8   : > { %s566_s24 = scalar_select %p111_p1, %s496_s17, %s113_s22  }
   0x9   : > { %p568_p5 = por %p124_p2, %p123_p0  ;;  %p572_p6 = por %p130_p4, %p129_p3 }
   0xa   : > { %p378_p7 = scmp.ge.s32.totalorder %s500_s18, 1  ;;  %p164_p8 = scmp.lt.s32.totalorder %s500_s18, 3 }
   0xc   : > { %p165_p9 = pnand %p378_p7, %p164_p8 }
   0xd   : > { %p189_p10 = scmp.lt.s32.totalorder (!%p165_p9), %s551_s19, 1  ;;  %vm196_vm0 = vcmask (!%p165_p9), 261120   ;;  %v502_v7 = vmov (!%p165_p9), 0.0   ;;  %vm503_vm1 = vmmov (!%p165_p9), 0   ;;  %v381_v12 = vld [vmem:[%s641_s2] ss:$0 sm:$0xff] (!%p165_p9) }
   0xe   : > { %168 = sbr.rel (%p165_p9) target bundleno = 566 (0x236), region = 36  ;;  %390 = vmatprep.subr.mxu0 (!%p165_p9), %v502_v7  ;;  %392 = vmatprep.mubr.msk.f32.mxu0 (!%p165_p9), %vm503_vm1, %v502_v7  ;;  %v382_v14 = vld [vmem:[%s642_s3] ss:$0 sm:$0xff] (!%p165_p9)  ;;  %vm226_vm2 = vcmask (!%p165_p9), 64512   ;;  %s186_s12 = sand.u32 (!%p165_p9), 1, %s492_s16   ;;  %vm300_vm3 = vcmask (!%p165_p9), 257024  }
   0xf   : > { %v225_v17 = vld [vmem:[%s639_s0] sm:$0xf] (!%p165_p9)  ;;  %s379_s13 = sshll.u32 (!%p165_p9), %s186_s12, 2  ;;  %s385_s14 = sshll.u32 (!%p165_p9), %s551_s19, 6 }
  0x10   : > { %s188_s20 = scalar_lea.vmem (!%p165_p9), [#allocation2], %s379_s13  ;;  %s303_s29 = scalar_lea.sflag (!%p165_p9), [#allocation3], %s186_s12 }
  0x11   : > { %s316_s22 = sshll.u32 (!%p165_p9), %s188_s20, 4  ;;  %s599_s22 = int_to_ptr.vmem [resolvable:$true] %s316_s22 }
  0x12   : > { %s438_s30 = scalar_lea.vmem (!%p165_p9), %s599_s22, 64 }
  0x13   : > { %p439_p11 = scmp.ne.s32.totalorder (!%p165_p9), %s599_s22, %s438_s30 }
  0x15   : > { %s190_s27 = scalar_select %p189_p10, %s551_s19, 1 }
  0x16   : > { %p440_p12 = pnand %p439_p11, %p568_p5  ;;  %s504_s19 = smov [#allocation2]  }
  0x17   : > { %s380_s28 = sshll.u32 %s190_s27, 3 }
  0x18   : > { %s192_s5 = scalar_lea.vmem %s640_s1, %s380_s28  ;;  %s597_s28 = scalar_lea.hbm %s643_s4, %s385_s14 }
  0x19   : > { %v193_v0 = vld [vmem:[%s192_s5] sm:$0xff]  ;;  %p441_p13 = pneg %p440_p12  ;;  %s442_s5 = sshll.u32 %s504_s19, 4  ;;  %s443_s5 = int_to_ptr.vmem [resolvable:$false] %s442_s5 }
  0x1a   : > { %v197_v1 = vsel %vm196_vm0, %v193_v0, 0.0  ;;  %s444_s6 = scalar_lea.vmem %s443_s5, 128  ;;  %p445_p0 = scmp.lt.s32.totalorder %s599_s22, %s443_s5 }
  0x1b   : > { %198 = vadd.xlane.f32.xlu0 %v197_v1  ;;  %p446_p1 = scmp.lt.s32.totalorder %s444_s6, %s438_s30 }
  0x1d   : > { %p447_p2 = por %p446_p1, %p445_p0 }
  0x1f   : > { %p448_p3 = pnand %p447_p2, %p441_p13 }
  0xa8   : > { %v199_v2 = vpop.xlane.xlu0 %198 }
  0xa9   : > { %v201_v3 = vmul.f32 0.03125, %v199_v2 }
  0xab   : > { %v202_v4 = vsub.f32 %v193_v0, %v201_v3 }
  0xad   : > { %v203_v5 = vmul.f32 %v202_v4, %v202_v4 }
  0xaf   : > { %v204_v6 = vsel %vm196_vm0, %v203_v5, 0.0 }
  0xb0   : > { %205 = vadd.xlane.f32.xlu0 %v204_v6 }
 0x13d   : > { %v206_v8 = vpop.xlane.xlu0 %205 }
 0x13e   : > { %v207_v9 = vmul.f32 0.03125, %v206_v8 }
 0x140   : > { %v208_v10 = vadd.f32 1e-05, %v207_v9 }
 0x142   : > { %436 = vrsqrt.f32 %v208_v10 }
 0x14c   : > { %v437_v11 = vpop.eup %436 }
 0x14d   : > { %v210_v13 = vmul.f32 %v437_v11, %v202_v4 }
 0x14f   : > { %v217_v15 = vmul.f32 %v381_v12, %v210_v13 }
 0x151   : > { %v224_v16 = vadd.f32 %v382_v14, %v217_v15 }
 0x153   : > { %391 = vmatpush3.msra.mxu0 %v224_v16 }
 0x154   : > { %393 = vmatmul.mubr.msk.f32.vlgmr.msra.gmra.mrb[0].mxu0 %vm226_vm2, %v225_v17 }
 0x227   : > { %v296_v18 = vpop.f32.mrb[0].mxu0 }
 0x228   : > { %301 = vst.msk [vmem:[%s188_s20] sm:$0xf] %vm300_vm3, %v296_v18  ;;  %v394_v19 = vpop.f32.mrb[1].mxu0 }
 0x229   : > { %451 = shalt.err (!%p448_p3)
}
 0x22a   : > { %s452_s7 = scalar_lea.hbm %s597_s28, 64  ;;  %s456_s10 = scalar_lea.hbm %s643_s4, 128 }
 0x22b   : > { %p453_p4 = scmp.ne.s32.totalorder %s597_s28, %s452_s7  ;;  %p457_p9 = scmp.lt.u32.totalorder %s597_s28, %s643_s4 }
 0x22c   : > { %p458_p10 = scmp.lt.u32.totalorder %s456_s10, %s452_s7  ;;  %p460_p12 = scmp.lt.u32.totalorder %s452_s7, %s597_s28 }
 0x22d   : > { %p454_p7 = pnand %p453_p4, %p568_p5 }
 0x22e   : > { %p459_p11 = por %p458_p10, %p457_p9 }
 0x22f   : > { %p455_p8 = pneg %p454_p7 }
 0x230   : > { %p461_p13 = por %p460_p12, %p459_p11 }
 0x232   : > { %p462_p0 = pnand %p461_p13, %p455_p8 }
 0x234   : > { %465 = shalt.err (!%p462_p0)
}
 0x235   : > { %395 = dma.vmem_to_hbm [thread:$0]  (%p568_p5), %s599_s22, 64, %s597_s28, %s303_s29  }
 0x236 PF: > { %p401_p1 = scmp.ge.s32.totalorder %s500_s18, 2  ;;  %s328_s13 = sand.u32 1, %s488_s15  }
 0x237   : > { %s329_s14 = scalar_lea.sflag [#allocation3], %s328_s13 }
 0x238   : > { %p398_p2 = pnand %p401_p1, %p572_p6 }
 0x23a   : > { %483 = dma.done.wait (!%p398_p2), %s329_s14, 64  }
 0x23b   : > { %485 = vsyncadd (!%p398_p2), %s329_s14, 4294967232  ;;  %p14_p3 = scmp.ge.s32.totalorder %s555_s21, 4   ;;  %s646_s15 = smov %s492_s16 }
 0x23c   : > { %s647_s16 = smov %s496_s17  ;;  %s648_s17 = smov %s566_s24 }
 0x23d   : > { %s649_s18 = smov %s555_s21  ;;  %16 = sbr.rel (!%p14_p3) target bundleno = 3 (0x3), region = 71 }
 0x244   :  { %334 = vsyncpa [#allocation3], 1 }
 0x245   :  { %336 = vsyncpa [#allocation3 + $0x1], 1 }

// kernel: whisper_forward.7
= control target key start
LH: loop header
LB: loop body
LE: loop exit
PB: predicated region body
PF: predicated region fallthrough
CT: control target
= control target key end

     0   :  { %s1615_s25 = smov 0   ;;  %s1783_s0 = inlined_call_operand.vmem [shape: f32[2,8,32], index: 0, kind: input, shape index: {}]   ;;  %s1784_s1 = inlined_call_operand.vmem [shape: f32[1,32], index: 1, kind: input, shape index: {}]   ;;  %s1785_s2 = inlined_call_operand.vmem [shape: f32[1,32], index: 2, kind: input, shape index: {}]   ;;  %s1786_s3 = inlined_call_operand.vmem [shape: bf16[32,96], index: 3, kind: input, shape index: {}]   ;;  %s1787_s4 = inlined_call_operand.vmem [shape: f32[1,96], index: 4, kind: input, shape index: {}]   ;;  %s1788_s5 = inlined_call_operand.vmem [shape: bf16[32,32], index: 5, kind: input, shape index: {}]   ;;  %s1789_s6 = inlined_call_operand.vmem [shape: f32[1,32], index: 6, kind: input, shape index: {}]   ;;  %s1790_s7 = inlined_call_operand.vmem [shape: f32[1,32], index: 7, kind: input, shape index: {}]   ;;  %s1791_s8 = inlined_call_operand.vmem [shape: f32[1,32], index: 8, kind: input, shape index: {}]   ;;  %s1792_s9 = inlined_call_operand.vmem [shape: bf16[32,64], index: 9, kind: input, shape index: {}]   ;;  %s1793_s10 = inlined_call_operand.vmem [shape: f32[1,64], index: 10, kind: input, shape index: {}]   ;;  %s1794_s11 = inlined_call_operand.vmem [shape: bf16[64,32], index: 11, kind: input, shape index: {}]   ;;  %s1795_s12 = inlined_call_operand.vmem [shape: f32[1,32], index: 12, kind: input, shape index: {}]   ;;  %s1796_s13 = inlined_call_operand.vmem [shape: f32[2,8,32], index: 13, kind: output, shape index: {}]  }
   0x1 LB: > { %s1312_s26 = sadd.s32 4294967295, %s1527_s25   ;;  %p1316_p0 = scmp.ge.s32.totalorder %s1527_s25, 1  ;;  %s1527_s25 = sphi %s1615_s25, %s23_s25  }
   0x2   : > { %p386_p1 = scmp.lt.s32.totalorder %s1527_s25, 3 }
   0x4   : > { %p387_p2 = pnand %p1316_p0, %p386_p1 }
   0x5   : > { %p428_p3 = scmp.lt.s32.totalorder (!%p387_p2), %s1312_s26, 1  ;;  %vm440_vm0 = vcmask (!%p387_p2), 261120   ;;  %v1489_v7 = vld [vmem:[%s1786_s3] sm:$0xff] (!%p387_p2)   ;;  %v1529_v8 = vmov (!%p387_p2), 0.0   ;;  %vm1530_vm1 = vmmov (!%p387_p2), 0   ;;  %v1490_v9 = vld [vmem:[%s1786_s3 + $0x8] sm:$0xff] (!%p387_p2)  }
   0x6   : > { %390 = sbr.rel (%p387_p2) target bundleno = 2579 (0xa13), region = 72  ;;  %1381 = vmatprep.subr.bf16.mxu0 (!%p387_p2), %v1529_v8  ;;  %1385 = vmatprep.mubr.msk.bf16.mxu0 (!%p387_p2), %vm1530_vm1, %v1529_v8  ;;  %v1319_v14 = vld [vmem:[%s1784_s1] ss:$0 sm:$0xff] (!%p387_p2)  ;;  %s1531_s24 = smov (!%p387_p2), 96   ;;  %vm542_vm2 = vcmask (!%p387_p2), 64512   ;;  %vm606_vm3 = vcmask (!%p387_p2), 1043456  }
   0x7   : > { %1382 = vmatpush3.bf16.msra.mxu0 (!%p387_p2), %v1489_v7  ;;  %1389 = vmatprep.subr.bf16.mxu1 (!%p387_p2), %v1529_v8  ;;  %v1320_v16 = vld [vmem:[%s1785_s2] ss:$0 sm:$0xff] (!%p387_p2)  ;;  %s1532_s28 = smov (!%p387_p2), 120   ;;  %s1533_s29 = smov (!%p387_p2), 88   ;;  %vm994_vm4 = vcmask (!%p387_p2), 130048   ;;  %vm996_vm5 = vcmask (!%p387_p2), 195584  }
   0x8   : > { %1383 = vmatprep.subr.bf16.mxu0 (!%p387_p2), %v1529_v8  ;;  %1391 = vmatprep.mubr.msk.bf16.mxu1 (!%p387_p2), %vm1530_vm1, %v1529_v8  ;;  %v1321_v20 = vld [vmem:[%s1787_s4] ss:$0 sm:$0xff] (!%p387_p2)  ;;  %s1535_s14 = smov (!%p387_p2), 112   ;;  %s1536_s15 = smov (!%p387_p2), 72   ;;  %vm1205_vm6 = vcmask (!%p387_p2), 523264  }
   0x9   : > { %s1537_s16 = smov (!%p387_p2), 104   ;;  %s1538_s17 = smov (!%p387_p2), 64  }
   0xa   : > { %s1539_s18 = smov (!%p387_p2), 56   ;;  %s1540_s19 = smov (!%p387_p2), 48  }
   0xb   : > { %1384 = vmatpush3.bf16.msra.mxu0 (!%p387_p2), %v1490_v9  ;;  %s1541_s20 = smov (!%p387_p2), 40   ;;  %s1542_s21 = smov (!%p387_p2), 8  }
   0xc   : > { %1395 = vmatprep.subr.bf16.mxu0 (!%p387_p2), %v1529_v8 }
   0xd   : > { %s1798_s26 = smov (!%p428_p3, %s1312_s26), 1 }
   0xe   : > { %s1317_s27 = sshll.u32 %s1798_s26, 3 }
   0xf   : > { %s431_s30 = scalar_lea.vmem %s1783_s0, %s1317_s27 }
  0x10   : > { %v1631_v0 = vld [vmem:[%s431_s30] sm:$0xff]  ;;  %s1534_s30 = smov 80  }
  0x11   : > { %v441_v1 = vsel %vm440_vm0, %v1631_v0, 0.0 }
  0x12   : > { %442 = vadd.xlane.f32.xlu0 %v441_v1 }
  0x9f   : > { %v443_v2 = vpop.xlane.xlu0 %442 }
  0xa0   : > { %v445_v3 = vmul.f32 0.03125, %v443_v2 }
  0xa2   : > { %v446_v4 = vsub.f32 %v1631_v0, %v445_v3 }
  0xa4   : > { %v447_v5 = vmul.f32 %v446_v4, %v446_v4 }
  0xa6   : > { %v448_v6 = vsel %vm440_vm0, %v447_v5, 0.0 }
  0xa7   : > { %449 = vadd.xlane.f32.xlu0 %v448_v6 }
 0x134   : > { %v450_v10 = vpop.xlane.xlu0 %449 }
 0x135   : > { %v451_v11 = vmul.f32 0.03125, %v450_v10 }
 0x137   : > { %v452_v12 = vadd.f32 1e-05, %v451_v11 }
 0x139   : > { %1499 = vrsqrt.f32 %v452_v12 }
 0x143   : > { %v1500_v13 = vpop.eup %1499 }
 0x144   : > { %v454_v15 = vmul.f32 %v1500_v13, %v446_v4 }
 0x146   : > { %v461_v17 = vmul.f32 %v1319_v14, %v454_v15 }
 0x148   : > { %v468_v18 = vadd.f32 %v1320_v16, %v461_v17 }
 0x14a   : > { %v473_v19 = vpack.c.bf16 %v468_v18, %v468_v18 }
 0x14c   : > { %1386 = vmatmul.mubr.msk.bf16.vlgmr.msra.gmra.mrb[0].mxu0 %vm440_vm0, %v473_v19 }
 0x14d   : > { %1397 = vmatprep.mubr.msk.bf16.mxu0 %vm1530_vm1, %v1529_v8 }
 0x21f   : > { %v530_v21 = vpop.f32.mrb[0].mxu0 }
 0x220   : > { %v531_v22 = vadd.f32 %v1321_v20, %v530_v21  ;;  %v1387_v23 = vpop.f32.mrb[1].mxu0 }
 0x221   : > { %v533_v24 = vpop.f32.mrb[2].mxu0 }
 0x222   : > { %v536_v25 = vmul.f32 0.35355338, %v531_v22  ;;  %v1663_v26 = vpack.c.bf16 %v531_v22, %v531_v22  ;;  %v1388_v27 = vpop.f32.mrb[3].mxu0 }
 0x224   : > { %v537_v28 = vpack.c.bf16 %v536_v25, %v536_v25  ;;  %540 = vrot.lane.b32.xlu1 %v1663_v26, %s1531_s24  ;;  %s435_s24 = scalar_lea.vmem %s1796_s13, %s1317_s27 }
 0x226   : > { %651 = vrot.lane.b32.xlu0 %v537_v28, %s1532_s28 }
 0x228   : > { %653 = vrot.lane.b32.xlu1 %v1663_v26, %s1533_s29  ;;  %s1543_s29 = smov 16  }
 0x22c   : > { %763 = vrot.lane.b32.xlu1 %v1663_v26, %s1534_s30  ;;  %s1544_s30 = smov 24  }
 0x230   : > { %761 = vrot.lane.b32.xlu1 %v537_v28, %s1535_s14 }
 0x234   : > { %873 = vrot.lane.b32.xlu1 %v1663_v26, %s1536_s15 }
 0x238   : > { %871 = vrot.lane.b32.xlu1 %v537_v28, %s1537_s16 }
 0x296   : > { %v541_v29 = vpop.permute.xlu1 %540 }
 0x297   : > { %v547_v30 = vsel %vm542_vm2, %v541_v29, 0 }
 0x298   : > { %1390 = vmatpush3.bf16.xpose.msra.mxu1 %v547_v30  ;;  %v652_v34 = vpop.permute.xlu0 %651 }
 0x299   : > { %1401 = vmatprep.subr.bf16.mxu1 %v1529_v8 }
 0x29a   : > { %v654_v31 = vpop.permute.xlu1 %653 }
 0x29b   : > { %v659_v32 = vsel %vm542_vm2, %v654_v31, 0 }
 0x29e   : > { %v764_v33 = vpop.permute.xlu1 %763 }
 0x29f   : > { %1392 = vmatmul.mubr.msk.bf16.vlgmr.msra.gmra.mrb[0].mxu1 %vm542_vm2, %v537_v28  ;;  %v769_v36 = vsel %vm542_vm2, %v764_v33, 0 }
 0x2a0   : > { %1402 = vmatpush3.bf16.xpose.msra.mxu1 %v659_v32  ;;  %1403 = vmatprep.mubr.msk.bf16.mxu1 %vm1530_vm1, %v1529_v8 }
 0x2a1   : > { %1413 = vmatprep.subr.bf16.mxu1 %v1529_v8 }
 0x2a2   : > { %v762_v35 = vpop.permute.xlu1 %761 }
 0x2a6   : > { %v874_v37 = vpop.permute.xlu1 %873 }
 0x2a7   : > { %1404 = vmatmul.mubr.msk.bf16.vlgmr.msra.gmra.mrb[4].mxu1 %vm542_vm2, %v652_v34  ;;  %v879_v38 = vsel %vm542_vm2, %v874_v37, 0 }
 0x2a8   : > { %1414 = vmatpush3.bf16.xpose.msra.mxu1 %v769_v36  ;;  %1415 = vmatprep.mubr.msk.bf16.mxu1 %vm1530_vm1, %v1529_v8 }
 0x2a9   : > { %1425 = vmatprep.subr.bf16.mxu1 %v1529_v8 }
 0x2aa   : > { %v872_v39 = vpop.permute.xlu1 %871 }
 0x2af   : > { %1416 = vmatmul.mubr.msk.bf16.vlgmr.msra.gmra.mrb[8].mxu1 %vm542_vm2, %v762_v35 }
 0x2b0   : > { %1426 = vmatpush3.bf16.xpose.msra.mxu1 %v879_v38  ;;  %1427 = vmatprep.mubr.msk.bf16.mxu1 %vm1530_vm1, %v1529_v8 }
 0x2b1   : > { %1437 = vmatprep.subr.bf16.mxu1 %v1529_v8 }
 0x2b7   : > { %1428 = vmatmul.mubr.msk.bf16.vlgmr.msra.gmra.mrb[12].mxu1 %vm542_vm2, %v872_v39 }
 0x2b8   : > { %1441 = vmatprep.mubr.msk.bf16.mxu1 %vm1530_vm1, %v1529_v8 }
 0x372   : > { %v583_v40 = vpop.f32.mrb[0].mxu1 }
 0x373   : > { %v1393_v41 = vpop.f32.mrb[1].mxu1  ;;  %v589_v42 = vsel %vm542_vm2, %v583_v40, -inf }
 0x374   : > { %590 = vmax.xlane.f32.xlu1 %v589_v42  ;;  %v586_v43 = vpop.f32.mrb[2].mxu1 }
 0x375   : > { %v1394_v44 = vpop.f32.mrb[3].mxu1 }
 0x37a   : > { %v695_v45 = vpop.f32.mrb[4].mxu1 }
 0x37b   : > { %v1405_v46 = vpop.f32.mrb[5].mxu1  ;;  %v701_v47 = vsel %vm542_vm2, %v695_v45, -inf }
 0x37c   : > { %702 = vmax.xlane.f32.xlu0 %v701_v47  ;;  %v698_v48 = vpop.f32.mrb[6].mxu1 }
 0x37d   : > { %v1406_v49 = vpop.f32.mrb[7].mxu1 }
 0x382   : > { %v805_v50 = vpop.f32.mrb[8].mxu1 }
 0x383   : > { %v1417_v51 = vpop.f32.mrb[9].mxu1  ;;  %v811_v52 = vsel %vm542_vm2, %v805_v50, -inf }
 0x384   : > { %812 = vmax.xlane.f32.xlu1 %v811_v52  ;;  %v808_v53 = vpop.f32.mrb[10].mxu1  ;;  %v1492_v51 = vld [vmem:[%s1788_s5 + $0x8] sm:$0xff]  }
 0x385   : > { %v1418_v54 = vpop.f32.mrb[11].mxu1 }
 0x38a   : > { %v915_v55 = vpop.f32.mrb[12].mxu1 }
 0x38b   : > { %v1429_v56 = vpop.f32.mrb[13].mxu1  ;;  %v921_v57 = vsel %vm542_vm2, %v915_v55, -inf }
 0x38c   : > { %922 = vmax.xlane.f32.xlu0 %v921_v57  ;;  %v918_v58 = vpop.f32.mrb[14].mxu1 }
 0x38d   : > { %v1430_v59 = vpop.f32.mrb[15].mxu1 }
 0x401   : > { %v591_v60 = vpop.xlane.xlu1 %590 }
 0x402   : > { %v592_v61 = vsub.f32 %v583_v40, %v591_v60 }
 0x404   : > { %v593_v62 = vmul.f32 1.442695, %v592_v61 }
 0x406   : > { %1501 = vpow2.f32 %v593_v62 }
 0x409   : > { %v703_v63 = vpop.xlane.xlu0 %702 }
 0x40a   : > { %v704_v1 = vsub.f32 %v695_v45, %v703_v63 }
 0x40c   : > { %v705_v2 = vmul.f32 1.442695, %v704_v1 }
 0x40e   : > { %1503 = vpow2.f32 %v705_v2 }
 0x410   : > { %v1502_v3 = vpop.eup %1501 }
 0x411   : > { %v595_v4 = vsel %vm542_vm2, %v1502_v3, 0.0  ;;  %v813_v13 = vpop.xlane.xlu1 %812 }
 0x412   : > { %596 = vadd.xlane.f32.xlu1 %v595_v4  ;;  %v814_v14 = vsub.f32 %v805_v50, %v813_v13  ;;  %v1491_v50 = vld [vmem:[%s1788_s5] sm:$0xff]  }
 0x413   : > { %1438 = vmatpush3.bf16.msra.mxu1 %v1491_v50 }
 0x414   : > { %v815_v15 = vmul.f32 1.442695, %v814_v14  ;;  %1439 = vmatprep.subr.bf16.mxu1 %v1529_v8 }
 0x417   : > { %1440 = vmatpush3.bf16.msra.mxu1 %v1492_v51 }
 0x418   : > { %v1504_v5 = vpop.eup %1503  ;;  %1453 = vmatprep.subr.bf16.mxu1 %v1529_v8 }
 0x419   : > { %v923_v6 = vpop.xlane.xlu0 %922  ;;  %v707_v7 = vsel %vm542_vm2, %v1504_v5, 0.0 }
 0x41a   : > { %v924_v9 = vsub.f32 %v915_v55, %v923_v6  ;;  %708 = vadd.xlane.f32.xlu0 %v707_v7 }
 0x41c   : > { %v925_v10 = vmul.f32 1.442695, %v924_v9 }
 0x41e   : > { %1505 = vpow2.f32 %v925_v10 }
 0x41f   : > { %1507 = vpow2.f32 %v815_v15 }
 0x423   : > { %601 = vrot.lane.b32.xlu1 %v1663_v26, %s1538_s17 }
 0x428   : > { %v1506_v11 = vpop.eup %1505 }
 0x429   : > { %v927_v12 = vsel %vm542_vm2, %v1506_v11, 0.0  ;;  %v1508_v16 = vpop.eup %1507 }
 0x42a   : > { %928 = vadd.xlane.f32.xlu0 %v927_v12  ;;  %v817_v17 = vsel %vm542_vm2, %v1508_v16, 0.0 }
 0x440   : > { %713 = vrot.lane.b32.xlu0 %v1663_v26, %s1539_s18 }
 0x447   : > { %818 = vadd.xlane.f32.xlu1 %v817_v17 }
 0x458   : > { %823 = vrot.lane.b32.xlu1 %v1663_v26, %s1540_s19 }
 0x45c   : > { %933 = vrot.lane.b32.xlu1 %v1663_v26, %s1541_s20 }
 0x49f   : > { %v597_v18 = vpop.xlane.xlu1 %596 }
 0x4a0   : > { %1509 = vrcp.f32 %v597_v18  ;;  %v1493_v18 = vld [vmem:[%s1792_s9] sm:$0xff]  }
 0x4a3   : > { %v602_v19 = vpop.permute.xlu1 %601 }
 0x4a4   : > { %v608_v20 = vsel %vm606_vm3, %v602_v19, 0 }
 0x4a5   : > { %1396 = vmatpush3.bf16.msra.mxu0 %v608_v20 }
 0x4a6   : > { %1407 = vmatprep.subr.bf16.mxu0 %v1529_v8 }
 0x4a7   : > { %v709_v22 = vpop.xlane.xlu0 %708 }
 0x4a8   : > { %1511 = vrcp.f32 %v709_v22 }
 0x4aa   : > { %v1510_v21 = vpop.eup %1509 }
 0x4ab   : > { %v599_v23 = vmul.f32 %v1510_v21, %v1502_v3 }
 0x4ad   : > { %v600_v24 = vpack.c.bf16 %v599_v23, %v599_v23  ;;  %v1337_v23 = vld [vmem:[%s1790_s7] ss:$0 sm:$0xff] }
 0x4af   : > { %1398 = vmatmul.mubr.msk.bf16.vlgmr.msra.gmra.mrb[4].mxu0 %vm542_vm2, %v600_v24 }
 0x4b0   : > { %1409 = vmatprep.mubr.msk.bf16.mxu0 %vm1530_vm1, %v1529_v8 }
 0x4b2   : > { %v1512_v25 = vpop.eup %1511 }
 0x4b3   : > { %v711_v27 = vmul.f32 %v1512_v25, %v1504_v5  ;;  %v1336_v5 = vld [vmem:[%s1789_s6] ss:$0 sm:$0xff] }
 0x4b4   : > { %v1338_v25 = vld [vmem:[%s1791_s8] ss:$0 sm:$0xff] }
 0x4b5   : > { %v712_v30 = vpack.c.bf16 %v711_v27, %v711_v27 }
 0x4b7   : > { %v929_v26 = vpop.xlane.xlu0 %928 }
 0x4bb   : > { %v714_v28 = vpop.permute.xlu0 %713 }
 0x4bc   : > { %v719_v29 = vsel %vm606_vm3, %v714_v28, 0 }
 0x4bd   : > { %1408 = vmatpush3.bf16.msra.mxu0 %v719_v29  ;;  %v1495_v29 = vld [vmem:[%s1794_s11] sm:$0xff]  }
 0x4be   : > { %1419 = vmatprep.subr.bf16.mxu0 %v1529_v8 }
 0x4c0   : > { %1410 = vmatmul.mubr.msk.bf16.vlgmr.msra.gmra.mrb[8].mxu0 %vm542_vm2, %v712_v30  ;;  %v1496_v30 = vld [vmem:[%s1794_s11 + $0x8] sm:$0xff]  }
 0x4c1   : > { %1421 = vmatprep.mubr.msk.bf16.mxu0 %vm1530_vm1, %v1529_v8 }
 0x4d4   : > { %v819_v31 = vpop.xlane.xlu1 %818 }
 0x4d5   : > { %1513 = vrcp.f32 %v819_v31  ;;  %v1497_v31 = vld [vmem:[%s1794_s11 + $0x10] sm:$0xff]  }
 0x4d6   : > { %1515 = vrcp.f32 %v929_v26 }
 0x4d8   : > { %v824_v32 = vpop.permute.xlu1 %823 }
 0x4d9   : > { %v829_v33 = vsel %vm606_vm3, %v824_v32, 0  ;;  %v1498_v32 = vld [vmem:[%s1794_s11 + $0x18] sm:$0xff]  }
 0x4da   : > { %1420 = vmatpush3.bf16.msra.mxu0 %v829_v33  ;;  %v1339_v33 = vld [vmem:[%s1793_s10] ss:$0 sm:$0xff] }
 0x4db   : > { %1431 = vmatprep.subr.bf16.mxu0 %v1529_v8 }
 0x4dc   : > { %v934_v36 = vpop.permute.xlu1 %933 }
 0x4dd   : > { %v939_v39 = vsel %vm606_vm3, %v934_v36, 0 }
 0x4df   : > { %v1514_v34 = vpop.eup %1513 }
 0x4e0   : > { %v821_v35 = vmul.f32 %v1514_v34, %v1508_v16  ;;  %v1516_v38 = vpop.eup %1515 }
 0x4e1   : > { %v931_v40 = vmul.f32 %v1516_v38, %v1506_v11 }
 0x4e2   : > { %v822_v37 = vpack.c.bf16 %v821_v35, %v821_v35 }
 0x4e3   : > { %v932_v41 = vpack.c.bf16 %v931_v40, %v931_v40 }
 0x4e4   : > { %1422 = vmatmul.mubr.msk.bf16.vlgmr.msra.gmra.mrb[12].mxu0 %vm542_vm2, %v822_v37 }
 0x4e5   : > { %1432 = vmatpush3.bf16.msra.mxu0 %v939_v39  ;;  %1433 = vmatprep.mubr.msk.bf16.mxu0 %vm1530_vm1, %v1529_v8 }
 0x4e6   : > { %1445 = vmatprep.subr.bf16.mxu0 %v1529_v8 }
 0x4ec   : > { %1434 = vmatmul.mubr.msk.bf16.vlgmr.msra.gmra.mrb[16].mxu0 %vm542_vm2, %v932_v41 }
 0x4ed   : > { %1449 = vmatprep.mubr.msk.bf16.mxu0 %vm1530_vm1, %v1529_v8  ;;  %1446 = vmatpush3.bf16.msra.mxu0 %v1493_v18 }
 0x4ee   : > { %1447 = vmatprep.subr.bf16.mxu0 %v1529_v8 }
 0x582   : > { %v644_v42 = vpop.f32.mrb[4].mxu0 }
 0x583   : > { %v1399_v43 = vpop.f32.mrb[5].mxu0 }
 0x584   : > { %v647_v44 = vpop.f32.mrb[6].mxu0 }
 0x585   : > { %v1400_v45 = vpop.f32.mrb[7].mxu0 }
 0x593   : > { %v755_v46 = vpop.f32.mrb[8].mxu0 }
 0x594   : > { %982 = vrot.lane.b32.xlu0 %v755_v46, %s1542_s21  ;;  %v1411_v47 = vpop.f32.mrb[9].mxu0 }
 0x595   : > { %v758_v48 = vpop.f32.mrb[10].mxu0 }
 0x596   : > { %v1412_v49 = vpop.f32.mrb[11].mxu0 }
 0x597   : > { %v1348_v49 = vld [vmem:[%s1795_s12] ss:$0 sm:$0xff] }
 0x5b7   : > { %v865_v52 = vpop.f32.mrb[12].mxu0 }
 0x5b8   : > { %986 = vrot.lane.b32.xlu1 %v865_v52, %s1543_s29  ;;  %v1423_v53 = vpop.f32.mrb[13].mxu0 }
 0x5b9   : > { %v868_v54 = vpop.f32.mrb[14].mxu0 }
 0x5ba   : > { %v1424_v55 = vpop.f32.mrb[15].mxu0 }
 0x5bf   : > { %v975_v56 = vpop.f32.mrb[16].mxu0 }
 0x5c0   : > { %990 = vrot.lane.b32.xlu0 %v975_v56, %s1544_s30  ;;  %v1435_v57 = vpop.f32.mrb[17].mxu0 }
 0x5c1   : > { %v978_v58 = vpop.f32.mrb[18].mxu0 }
 0x5c2   : > { %v1436_v59 = vpop.f32.mrb[19].mxu0 }
 0x606   : > { %v983_v60 = vpop.permute.xlu0 %982 }
 0x607   : > { %v993_v62 = vsel %vm542_vm2, %v644_v42, %v983_v60 }
 0x62a   : > { %v987_v61 = vpop.permute.xlu1 %986 }
 0x62b   : > { %v995_v63 = vsel %vm994_vm4, %v993_v62, %v987_v61 }
 0x632   : > { %v991_v1 = vpop.permute.xlu0 %990 }
 0x633   : > { %v997_v2 = vsel %vm996_vm5, %v995_v63, %v991_v1 }
 0x634   : > { %v1002_v3 = vpack.c.bf16 %v997_v2, %v997_v2 }
 0x636   : > { %1442 = vmatmul.mubr.msk.bf16.vlgmr.msra.gmra.mrb[16].mxu1 %vm440_vm0, %v1002_v3 }
 0x637   : > { %1461 = vmatprep.mubr.msk.bf16.mxu1 %vm1530_vm1, %v1529_v8  ;;  %1454 = vmatpush3.bf16.msra.mxu1 %v1495_v29 }
 0x638   : > { %1455 = vmatprep.subr.bf16.mxu1 %v1529_v8 }
 0x63b   : > { %1456 = vmatpush3.bf16.msra.mxu1 %v1496_v30 }
 0x63c   : > { %1457 = vmatprep.subr.bf16.mxu1 %v1529_v8 }
 0x63f   : > { %1458 = vmatpush3.bf16.msra.mxu1 %v1497_v31 }
 0x640   : > { %1459 = vmatprep.subr.bf16.mxu1 %v1529_v8 }
 0x643   : > { %1460 = vmatpush3.bf16.msra.mxu1 %v1498_v32 }
 0x709   : > { %v1052_v4 = vpop.f32.mrb[16].mxu1 }
 0x70a   : > { %v1058_v6 = vadd.f32 %v1052_v4, %v1631_v0  ;;  %v1443_v7 = vpop.f32.mrb[17].mxu1  ;;  %v1494_v0 = vld [vmem:[%s1792_s9 + $0x8] sm:$0xff]  }
 0x70b   : > { %v1055_v9 = vpop.f32.mrb[18].mxu1  ;;  %1448 = vmatpush3.bf16.msra.mxu0 %v1494_v0 }
 0x70c   : > { %v1066_v10 = vadd.f32 %v1336_v5, %v1058_v6  ;;  %v1444_v11 = vpop.f32.mrb[19].mxu1 }
 0x70e   : > { %v1069_v12 = vsel %vm440_vm0, %v1066_v10, 0.0 }
 0x70f   : > { %1070 = vadd.xlane.f32.xlu1 %v1069_v12 }
 0x79c   : > { %v1071_v13 = vpop.xlane.xlu1 %1070 }
 0x79d   : > { %v1072_v14 = vmul.f32 0.03125, %v1071_v13 }
 0x79f   : > { %v1073_v15 = vsub.f32 %v1066_v10, %v1072_v14 }
 0x7a1   : > { %v1074_v16 = vmul.f32 %v1073_v15, %v1073_v15 }
 0x7a3   : > { %v1075_v17 = vsel %vm440_vm0, %v1074_v16, 0.0 }
 0x7a4   : > { %1076 = vadd.xlane.f32.xlu0 %v1075_v17 }
 0x831   : > { %v1077_v19 = vpop.xlane.xlu0 %1076 }
 0x832   : > { %v1078_v20 = vmul.f32 0.03125, %v1077_v19 }
 0x834   : > { %v1079_v21 = vadd.f32 1e-05, %v1078_v20 }
 0x836   : > { %1517 = vrsqrt.f32 %v1079_v21 }
 0x840   : > { %v1518_v22 = vpop.eup %1517 }
 0x841   : > { %v1081_v24 = vmul.f32 %v1518_v22, %v1073_v15 }
 0x843   : > { %v1088_v26 = vmul.f32 %v1337_v23, %v1081_v24 }
 0x845   : > { %v1095_v27 = vadd.f32 %v1338_v25, %v1088_v26 }
 0x847   : > { %v1100_v28 = vpack.c.bf16 %v1095_v27, %v1095_v27 }
 0x849   : > { %1450 = vmatmul.mubr.msk.bf16.vlgmr.msra.gmra.mrb[20].mxu0 %vm440_vm0, %v1100_v28 }
 0x91c   : > { %v1157_v34 = vpop.f32.mrb[20].mxu0 }
 0x91d   : > { %v1158_v35 = vadd.f32 %v1339_v33, %v1157_v34  ;;  %v1451_v36 = vpop.f32.mrb[21].mxu0 }
 0x91e   : > { %v1160_v37 = vpop.f32.mrb[22].mxu0 }
 0x91f   : > { %v1164_v38 = vmul.f32 0.044715, %v1158_v35  ;;  %v1452_v39 = vpop.f32.mrb[23].mxu0  ;;  %v1163_v45 = vmul.f32 0.5, %v1158_v35 }
 0x921   : > { %v1165_v40 = vmul.f32 %v1164_v38, %v1158_v35 }
 0x923   : > { %v1166_v41 = vmul.f32 %v1165_v40, %v1158_v35 }
 0x925   : > { %v1167_v42 = vadd.f32 %v1166_v41, %v1158_v35 }
 0x927   : > { %v1168_v43 = vmul.f32 0.7978846, %v1167_v42 }
 0x929   : > { %1519 = vtanh.f32 %v1168_v43 }
 0x933   : > { %v1520_v44 = vpop.eup %1519 }
 0x934   : > { %v1170_v8 = vadd.f32 1.0, %v1520_v44 }
 0x936   : > { %v1171_v46 = vmul.f32 %v1170_v8, %v1163_v45 }
 0x938   : > { %v1180_v47 = vpack.c.bf16 %v1171_v46, %v1171_v46 }
 0x93a   : > { %1462 = vmatmul.mubr.msk.bf16.vlgmr.msra.gmra.mrb[20].mxu1 %vm1205_vm6, %v1180_v47 }
 0xa0d   : > { %v1243_v48 = vpop.f32.mrb[20].mxu1 }
 0xa0e   : > { %v1249_v50 = vadd.f32 %v1243_v48, %v1066_v10  ;;  %v1463_v51 = vpop.f32.mrb[21].mxu1 }
 0xa0f   : > { %v1246_v52 = vpop.f32.mrb[22].mxu1 }
 0xa10   : > { %v1257_v53 = vadd.f32 %v1348_v49, %v1249_v50  ;;  %v1464_v54 = vpop.f32.mrb[23].mxu1 }
 0xa12   : > { %1258 = vst.msk [vmem:[%s435_s24] sm:$0xff] %vm440_vm0, %v1257_v53 }
 0xa13 PF: > { %s23_s25 = sadd.s32 1, %s1527_s25  }
 0xa14   : > { %p20_p4 = scmp.ge.s32.totalorder %s23_s25, 4  }
 0xa16   :  { %22 = sbr.rel (!%p20_p4) target bundleno = 1 (0x1), region = 102 }

</bundles_post_ra>
